<compile_context>
chip_gen: v5e
topology: v5e:2x2
jax: 0.10.0
libtpu: 0.0.40
codegen_flags: <defaults>
</compile_context>

<pallas_src>
import functools

import jax
import jax.numpy as jnp
from jax.experimental import pallas as pl
from jax.experimental.pallas import tpu as pltpu

LOG_SIG_MIN = -20.0
LOG_SIG_MAX = 2.0
LANE = 128


def _round_up(x, m):
    return ((x + m - 1) // m) * m


def _flat_actor_kernel(obs_ref, g_ref,
                       w1o_ref, w1g_ref, b1_ref,
                       w2_ref, b2_ref,
                       wh_ref, bh_ref,
                       lo_ref, hi_ref,
                       out_ref):
    # Activations arrive fp32; cast to bf16 for the MXU (weights are already
    # bf16 in HBM -> no in-kernel weight casts). All accumulation is fp32.
    obs = obs_ref[...].astype(jnp.bfloat16)                         # [Tb, obs_dim]
    g = g_ref[...].astype(jnp.bfloat16)                             # [Tb, g_dim]

    # Layer 1: fused obs/g concat -> split weight, shared bias add + relu (fp32).
    h1 = (jnp.dot(obs, w1o_ref[...], preferred_element_type=jnp.float32)
          + jnp.dot(g, w1g_ref[...], preferred_element_type=jnp.float32)
          + b1_ref[...])
    h1 = jnp.maximum(h1, 0.0)                                       # [Tb, H] fp32

    # Layer 2.
    h2 = jnp.dot(h1.astype(jnp.bfloat16), w2_ref[...],
                 preferred_element_type=jnp.float32) + b2_ref[...]
    h2 = jnp.maximum(h2, 0.0)                                       # [Tb, H] fp32

    # Fused, lane-dense heads: [Tb, 128] = [mean | logstd | zero-pad].
    head = jnp.dot(h2.astype(jnp.bfloat16), wh_ref[...],
                   preferred_element_type=jnp.float32) + bh_ref[...]

    # Per-column clamp via precomputed lo/hi rows: mean / pad columns get
    # (-inf, +inf) no-ops, logstd columns get (LOG_SIG_MIN, LOG_SIG_MAX).
    # Two sublane-broadcast VPU ops; no iota, no select.
    out_ref[...] = jnp.minimum(jnp.maximum(head, lo_ref[...]), hi_ref[...])


@functools.partial(jax.jit, static_argnames=("dim_out",))
def flat_actor_forward(obs, g, params, *, dim_out):
    """FlatActor.forward: Gaussian-policy MLP; concat, heads and clamp fused in-kernel."""
    B, obs_dim = obs.shape
    g_dim = g.shape[1]
    H = params["w1_obs"].shape[1]
    out_pad = params["wh"].shape[1]          # lane-dense fused-head width (mult of 128)
    two_out = 2 * dim_out

    # Batch tiling: one grid step for small/medium batches (no per-step
    # overhead; no duplicated weight DMA across v7x's two cores). Only tile +
    # shard "parallel" for large batches.
    if B <= 512:
        tile_b = _round_up(B, 8)
    else:
        tile_b = 256
    b_pad = _round_up(B, tile_b)
    if b_pad != B:
        pad = ((0, b_pad - B), (0, 0))
        obs = jnp.pad(obs, pad)
        g = jnp.pad(g, pad)
    grid = (b_pad // tile_b,)

    flops = 2 * b_pad * ((obs_dim + g_dim) * H + H * H + H * out_pad)
    bytes_accessed = (
        4 * b_pad * (obs_dim + g_dim + out_pad)               # fp32 activations + out
        + 2 * ((obs_dim + g_dim) * H + H * H + H * out_pad)   # bf16 weights
        + 4 * (2 * H + 3 * out_pad))                          # fp32 biases + clamp rows

    out = pl.pallas_call(
        _flat_actor_kernel,
        out_shape=jax.ShapeDtypeStruct((b_pad, out_pad), jnp.float32),
        grid_spec=pltpu.PrefetchScalarGridSpec(
            num_scalar_prefetch=0,
            grid=grid,
            in_specs=[
                # activations: stream per batch tile
                pl.BlockSpec((tile_b, obs_dim), lambda i: (i, 0)),
                pl.BlockSpec((tile_b, g_dim), lambda i: (i, 0)),
                # weights / biases / clamp rows: constant index_map -> VMEM-resident
                pl.BlockSpec((obs_dim, H), lambda i: (0, 0)),
                pl.BlockSpec((g_dim, H), lambda i: (0, 0)),
                pl.BlockSpec((1, H), lambda i: (0, 0)),
                pl.BlockSpec((H, H), lambda i: (0, 0)),
                pl.BlockSpec((1, H), lambda i: (0, 0)),
                pl.BlockSpec((H, out_pad), lambda i: (0, 0)),
                pl.BlockSpec((1, out_pad), lambda i: (0, 0)),
                pl.BlockSpec((1, out_pad), lambda i: (0, 0)),
                pl.BlockSpec((1, out_pad), lambda i: (0, 0)),
            ],
            out_specs=pl.BlockSpec((tile_b, out_pad), lambda i: (i, 0)),
        ),
        compiler_params=pltpu.CompilerParams(
            dimension_semantics=("parallel",)),
        cost_estimate=pl.CostEstimate(flops=flops, transcendentals=0,
                                      bytes_accessed=bytes_accessed),
    )(obs, g,
      params["w1_obs"], params["w1_g"], params["b1"],
      params["w2"], params["b2"],
      params["wh"], params["bh"],
      params["clip_lo"], params["clip_hi"])

    if b_pad != B:
        out = out[:B]
    mean = out[:, :dim_out]
    logstd = out[:, dim_out:two_out]
    return mean, logstd


def init_params(key, obs_dim, g_dim, dim_out, hidden):
    """Deterministic synthetic parameters (weights stored [in, out]).

    w1 is split into obs/g parts; the two head layers are fused into a single
    weight/bias zero-padded to a 128-lane-dense width; weights are pre-cast to
    bf16 for HBM storage (biases and clamp rows stay fp32).
    """
    ks = jax.random.split(key, 8)
    dim_inp = obs_dim + g_dim
    out_pad = _round_up(2 * dim_out, LANE)

    def lin(kw, kb, fan_in, fan_out):
        bound = 1.0 / jnp.sqrt(fan_in)
        w = jax.random.uniform(kw, (fan_in, fan_out), jnp.float32, -bound, bound)
        b = jax.random.uniform(kb, (1, fan_out), jnp.float32, -bound, bound)
        return w, b

    w1, b1 = lin(ks[0], ks[1], dim_inp, hidden)
    w2, b2 = lin(ks[2], ks[3], hidden, hidden)
    wm, bm = lin(ks[4], ks[5], hidden, dim_out)
    ws, bs = lin(ks[6], ks[7], hidden, dim_out)

    # Fuse heads and zero-pad fused N up to a multiple of 128 (lane-dense output).
    wh = jnp.zeros((hidden, out_pad), jnp.float32)
    wh = wh.at[:, :dim_out].set(wm).at[:, dim_out:2 * dim_out].set(ws)
    bh = jnp.zeros((1, out_pad), jnp.float32)
    bh = bh.at[:, :dim_out].set(bm).at[:, dim_out:2 * dim_out].set(bs)

    # Per-column clamp bounds: only logstd columns are clamped.
    col = jnp.arange(out_pad)[None, :]
    is_logstd = (col >= dim_out) & (col < 2 * dim_out)
    clip_lo = jnp.where(is_logstd, LOG_SIG_MIN, -jnp.inf).astype(jnp.float32)
    clip_hi = jnp.where(is_logstd, LOG_SIG_MAX, jnp.inf).astype(jnp.float32)

    return dict(
        w1_obs=w1[:obs_dim].astype(jnp.bfloat16),
        w1_g=w1[obs_dim:].astype(jnp.bfloat16),
        b1=b1,
        w2=w2.astype(jnp.bfloat16), b2=b2,
        wh=wh.astype(jnp.bfloat16), bh=bh,
        clip_lo=clip_lo, clip_hi=clip_hi,
    )


if __name__ == "__main__":
    key = jax.random.PRNGKey(0)
    k_obs, k_g, k_param = jax.random.split(key, 3)

    # Batch several actor invocations together while keeping the model small.
    batch = 256
    obs_dim, g_dim = 16, 16          # dim_inp = 32
    dim_out = 8
    hidden = 256

    obs = jax.random.normal(k_obs, (batch, obs_dim), jnp.float32)
    g = jax.random.normal(k_g, (batch, g_dim), jnp.float32)
    params = init_params(k_param, obs_dim, g_dim, dim_out, hidden)

    mean, logstd = flat_actor_forward(obs, g, params, dim_out=dim_out)
    jax.block_until_ready((mean, logstd))

    # Pure-JAX fp32 reference using the same (bf16-stored) weights upcast to
    # fp32, so the comparison isolates only bf16-activation MXU rounding.
    inp = jnp.concatenate([obs, g], axis=-1)
    w1 = jnp.concatenate([params["w1_obs"], params["w1_g"]],
                         axis=0).astype(jnp.float32)
    w2 = params["w2"].astype(jnp.float32)
    wh = params["wh"].astype(jnp.float32)[:, :2 * dim_out]
    bh = params["bh"][:, :2 * dim_out]
    h1 = jnp.maximum(inp @ w1 + params["b1"], 0.0)
    h2 = jnp.maximum(h1 @ w2 + params["b2"], 0.0)
    head_ref = h2 @ wh + bh
    mean_ref = head_ref[:, :dim_out]
    logstd_ref = jnp.clip(head_ref[:, dim_out:], LOG_SIG_MIN, LOG_SIG_MAX)

    tol = dict(atol=5e-2, rtol=5e-2)
    assert mean.shape == (batch, dim_out) and logstd.shape == (batch, dim_out)
    assert jnp.allclose(mean, mean_ref, **tol), "mean mismatch"
    assert jnp.allclose(logstd, logstd_ref, **tol), "logstd mismatch"
    assert bool(jnp.all(logstd <= LOG_SIG_MAX)) and bool(jnp.all(logstd >= LOG_SIG_MIN))

    # TODO(synk): FlatActor.sample() (rsample + tanh squash + log_prob) is a
    # sampling-time utility, not part of forward(); left to host-side JAX.
    print("KERNEL_OK")
</pallas_src>

<mosaic_0001>
module attributes {stable_mosaic.version = 11 : i64} {
  func.func @_flat_actor_kernel(%arg0: i32, %arg1: memref<256x16xf32, #tpu.memory_space<vmem>>, %arg2: memref<256x16xf32, #tpu.memory_space<vmem>>, %arg3: memref<16x256xbf16, #tpu.memory_space<vmem>>, %arg4: memref<16x256xbf16, #tpu.memory_space<vmem>>, %arg5: memref<1x256xf32, #tpu.memory_space<vmem>>, %arg6: memref<256x256xbf16, #tpu.memory_space<vmem>>, %arg7: memref<1x256xf32, #tpu.memory_space<vmem>>, %arg8: memref<256x128xbf16, #tpu.memory_space<vmem>>, %arg9: memref<1x128xf32, #tpu.memory_space<vmem>>, %arg10: memref<1x128xf32, #tpu.memory_space<vmem>>, %arg11: memref<1x128xf32, #tpu.memory_space<vmem>>, %arg12: memref<256x128xf32, #tpu.memory_space<vmem>>) attributes {dimension_semantics = [#tpu.dimension_semantics<parallel>], iteration_bounds = array<i64: 1>, scalar_prefetch = 0 : i64, scratch_operands = 0 : i64, tpu.core_type = #tpu.core_type<tc>, window_params = [{transform_indices = @transform_0, window_bounds = array<i64: 256, 16>}, {transform_indices = @transform_1, window_bounds = array<i64: 256, 16>}, {pipeline_mode = #tpu.pipeline_mode<synchronous>, transform_indices = @transform_2, window_bounds = array<i64: 16, 256>}, {pipeline_mode = #tpu.pipeline_mode<synchronous>, transform_indices = @transform_3, window_bounds = array<i64: 16, 256>}, {pipeline_mode = #tpu.pipeline_mode<synchronous>, transform_indices = @transform_4, window_bounds = array<i64: 1, 256>}, {pipeline_mode = #tpu.pipeline_mode<synchronous>, transform_indices = @transform_5, window_bounds = array<i64: 256, 256>}, {pipeline_mode = #tpu.pipeline_mode<synchronous>, transform_indices = @transform_6, window_bounds = array<i64: 1, 256>}, {pipeline_mode = #tpu.pipeline_mode<synchronous>, transform_indices = @transform_7, window_bounds = array<i64: 256, 128>}, {pipeline_mode = #tpu.pipeline_mode<synchronous>, transform_indices = @transform_8, window_bounds = array<i64: 1, 128>}, {pipeline_mode = #tpu.pipeline_mode<synchronous>, transform_indices = @transform_9, window_bounds = array<i64: 1, 128>}, {pipeline_mode = #tpu.pipeline_mode<synchronous>, transform_indices = @transform_10, window_bounds = array<i64: 1, 128>}, {transform_indices = @transform_11, window_bounds = array<i64: 256, 128>}]} {
    %c0 = arith.constant 0 : index
    %c0_0 = arith.constant 0 : index
    %0 = vector.load %arg1[%c0, %c0_0] : memref<256x16xf32, #tpu.memory_space<vmem>>, vector<256x16xf32>
    %1 = arith.truncf %0 : vector<256x16xf32> to vector<256x16xbf16>
    %c0_1 = arith.constant 0 : index
    %c0_2 = arith.constant 0 : index
    %2 = vector.load %arg2[%c0_1, %c0_2] : memref<256x16xf32, #tpu.memory_space<vmem>>, vector<256x16xf32>
    %3 = arith.truncf %2 : vector<256x16xf32> to vector<256x16xbf16>
    %c0_3 = arith.constant 0 : index
    %c0_4 = arith.constant 0 : index
    %4 = vector.load %arg3[%c0_3, %c0_4] : memref<16x256xbf16, #tpu.memory_space<vmem>>, vector<16x256xbf16>
    %cst = arith.constant dense<0.000000e+00> : vector<256x256xf32>
    %5 = tpu.matmul %1, %4, %cst {dimension_numbers = #tpu.dot_dimension_numbers<[1], [0], [0], [1], [0, 0, 1, 1], [], []>} : vector<256x16xbf16>, vector<16x256xbf16>, vector<256x256xf32> -> vector<256x256xf32>
    %c0_5 = arith.constant 0 : index
    %c0_6 = arith.constant 0 : index
    %6 = vector.load %arg4[%c0_5, %c0_6] : memref<16x256xbf16, #tpu.memory_space<vmem>>, vector<16x256xbf16>
    %cst_7 = arith.constant dense<0.000000e+00> : vector<256x256xf32>
    %7 = tpu.matmul %3, %6, %cst_7 {dimension_numbers = #tpu.dot_dimension_numbers<[1], [0], [0], [1], [0, 0, 1, 1], [], []>} : vector<256x16xbf16>, vector<16x256xbf16>, vector<256x256xf32> -> vector<256x256xf32>
    %8 = arith.addf %5, %7 : vector<256x256xf32>
    %c0_8 = arith.constant 0 : index
    %c0_9 = arith.constant 0 : index
    %9 = vector.load %arg5[%c0_8, %c0_9] : memref<1x256xf32, #tpu.memory_space<vmem>>, vector<1x256xf32>
    %10 = vector.broadcast %9 : vector<1x256xf32> to vector<256x256xf32>
    %11 = arith.addf %8, %10 : vector<256x256xf32>
    %cst_10 = arith.constant 0.000000e+00 : f32
    %12 = vector.broadcast %cst_10 : f32 to vector<256x256xf32>
    %13 = arith.maximumf %11, %12 : vector<256x256xf32>
    %14 = arith.truncf %13 : vector<256x256xf32> to vector<256x256xbf16>
    %c0_11 = arith.constant 0 : index
    %c0_12 = arith.constant 0 : index
    %15 = vector.load %arg6[%c0_11, %c0_12] : memref<256x256xbf16, #tpu.memory_space<vmem>>, vector<256x256xbf16>
    %cst_13 = arith.constant dense<0.000000e+00> : vector<256x256xf32>
    %16 = tpu.matmul %14, %15, %cst_13 {dimension_numbers = #tpu.dot_dimension_numbers<[1], [0], [0], [1], [0, 0, 1, 1], [], []>} : vector<256x256xbf16>, vector<256x256xbf16>, vector<256x256xf32> -> vector<256x256xf32>
    %c0_14 = arith.constant 0 : index
    %c0_15 = arith.constant 0 : index
    %17 = vector.load %arg7[%c0_14, %c0_15] : memref<1x256xf32, #tpu.memory_space<vmem>>, vector<1x256xf32>
    %18 = vector.broadcast %17 : vector<1x256xf32> to vector<256x256xf32>
    %19 = arith.addf %16, %18 : vector<256x256xf32>
    %cst_16 = arith.constant 0.000000e+00 : f32
    %20 = vector.broadcast %cst_16 : f32 to vector<256x256xf32>
    %21 = arith.maximumf %19, %20 : vector<256x256xf32>
    %22 = arith.truncf %21 : vector<256x256xf32> to vector<256x256xbf16>
    %c0_17 = arith.constant 0 : index
    %c0_18 = arith.constant 0 : index
    %23 = vector.load %arg8[%c0_17, %c0_18] : memref<256x128xbf16, #tpu.memory_space<vmem>>, vector<256x128xbf16>
    %cst_19 = arith.constant dense<0.000000e+00> : vector<256x128xf32>
    %24 = tpu.matmul %22, %23, %cst_19 {dimension_numbers = #tpu.dot_dimension_numbers<[1], [0], [0], [1], [0, 0, 1, 1], [], []>} : vector<256x256xbf16>, vector<256x128xbf16>, vector<256x128xf32> -> vector<256x128xf32>
    %c0_20 = arith.constant 0 : index
    %c0_21 = arith.constant 0 : index
    %25 = vector.load %arg9[%c0_20, %c0_21] : memref<1x128xf32, #tpu.memory_space<vmem>>, vector<1x128xf32>
    %26 = vector.broadcast %25 : vector<1x128xf32> to vector<256x128xf32>
    %27 = arith.addf %24, %26 : vector<256x128xf32>
    %c0_22 = arith.constant 0 : index
    %c0_23 = arith.constant 0 : index
    %28 = vector.load %arg10[%c0_22, %c0_23] : memref<1x128xf32, #tpu.memory_space<vmem>>, vector<1x128xf32>
    %29 = vector.broadcast %28 : vector<1x128xf32> to vector<256x128xf32>
    %30 = arith.maximumf %27, %29 : vector<256x128xf32>
    %c0_24 = arith.constant 0 : index
    %c0_25 = arith.constant 0 : index
    %31 = vector.load %arg11[%c0_24, %c0_25] : memref<1x128xf32, #tpu.memory_space<vmem>>, vector<1x128xf32>
    %32 = vector.broadcast %31 : vector<1x128xf32> to vector<256x128xf32>
    %33 = arith.minimumf %30, %32 : vector<256x128xf32>
    %c0_26 = arith.constant 0 : index
    %c0_27 = arith.constant 0 : index
    %34 = vector.load %arg12[%c0_26, %c0_27] : memref<256x128xf32, #tpu.memory_space<vmem>>, vector<256x128xf32>
    tpu.vector_store %arg12[%c0_26, %c0_27], %33 {strides = array<i32>} : memref<256x128xf32, #tpu.memory_space<vmem>>, vector<256x128xf32>,
    return
  }
  func.func @transform_0(%arg0: i32) -> (i32, i32) {
    %c0_i32 = arith.constant 0 : i32
    %c0_i32_0 = arith.constant 0 : i32
    return %arg0, %c0_i32 : i32, i32
  }
  func.func @transform_1(%arg0: i32) -> (i32, i32) {
    %c0_i32 = arith.constant 0 : i32
    %c0_i32_0 = arith.constant 0 : i32
    return %arg0, %c0_i32 : i32, i32
  }
  func.func @transform_2(%arg0: i32) -> (i32, i32) {
    %c0_i32 = arith.constant 0 : i32
    %c0_i32_0 = arith.constant 0 : i32
    %c0_i32_1 = arith.constant 0 : i32
    return %c0_i32, %c0_i32_0 : i32, i32
  }
  func.func @transform_3(%arg0: i32) -> (i32, i32) {
    %c0_i32 = arith.constant 0 : i32
    %c0_i32_0 = arith.constant 0 : i32
    %c0_i32_1 = arith.constant 0 : i32
    return %c0_i32, %c0_i32_0 : i32, i32
  }
  func.func @transform_4(%arg0: i32) -> (i32, i32) {
    %c0_i32 = arith.constant 0 : i32
    %c0_i32_0 = arith.constant 0 : i32
    %c0_i32_1 = arith.constant 0 : i32
    return %c0_i32, %c0_i32_0 : i32, i32
  }
  func.func @transform_5(%arg0: i32) -> (i32, i32) {
    %c0_i32 = arith.constant 0 : i32
    %c0_i32_0 = arith.constant 0 : i32
    %c0_i32_1 = arith.constant 0 : i32
    return %c0_i32, %c0_i32_0 : i32, i32
  }
  func.func @transform_6(%arg0: i32) -> (i32, i32) {
    %c0_i32 = arith.constant 0 : i32
    %c0_i32_0 = arith.constant 0 : i32
    %c0_i32_1 = arith.constant 0 : i32
    return %c0_i32, %c0_i32_0 : i32, i32
  }
  func.func @transform_7(%arg0: i32) -> (i32, i32) {
    %c0_i32 = arith.constant 0 : i32
    %c0_i32_0 = arith.constant 0 : i32
    %c0_i32_1 = arith.constant 0 : i32
    return %c0_i32, %c0_i32_0 : i32, i32
  }
  func.func @transform_8(%arg0: i32) -> (i32, i32) {
    %c0_i32 = arith.constant 0 : i32
    %c0_i32_0 = arith.constant 0 : i32
    %c0_i32_1 = arith.constant 0 : i32
    return %c0_i32, %c0_i32_0 : i32, i32
  }
  func.func @transform_9(%arg0: i32) -> (i32, i32) {
    %c0_i32 = arith.constant 0 : i32
    %c0_i32_0 = arith.constant 0 : i32
    %c0_i32_1 = arith.constant 0 : i32
    return %c0_i32, %c0_i32_0 : i32, i32
  }
  func.func @transform_10(%arg0: i32) -> (i32, i32) {
    %c0_i32 = arith.constant 0 : i32
    %c0_i32_0 = arith.constant 0 : i32
    %c0_i32_1 = arith.constant 0 : i32
    return %c0_i32, %c0_i32_0 : i32, i32
  }
  func.func @transform_11(%arg0: i32) -> (i32, i32) {
    %c0_i32 = arith.constant 0 : i32
    %c0_i32_0 = arith.constant 0 : i32
    return %arg0, %c0_i32 : i32, i32
  }
}

</mosaic_0001>

<bundles_post_ra>
// kernel: flat_actor_forward.1
= control target key start
LH: loop header
LB: loop body
LE: loop exit
PB: predicated region body
PF: predicated region fallthrough
CT: control target
= control target key end

     0   :  { %vm149_vm0 = vcmask 130048   ;;  %s3380_s3 = inlined_call_operand.vmem [shape: bf16[16,256], index: 3, kind: input, shape index: {}]   ;;  %s3381_s1 = inlined_call_operand.vmem [shape: f32[256,16], index: 1, kind: input, shape index: {}]   ;;  %s3382_s2 = inlined_call_operand.vmem [shape: bf16[16,256], index: 2, kind: input, shape index: {}]   ;;  %s3383_s5 = inlined_call_operand.vmem [shape: bf16[256,256], index: 5, kind: input, shape index: {}]   ;;  %s3384_s0 = inlined_call_operand.vmem [shape: f32[256,16], index: 0, kind: input, shape index: {}]   ;;  %s3385_s7 = inlined_call_operand.vmem [shape: bf16[256,128], index: 7, kind: input, shape index: {}]   ;;  %s3386_s4 = inlined_call_operand.vmem [shape: f32[1,256], index: 4, kind: input, shape index: {}]   ;;  %s3387_s6 = inlined_call_operand.vmem [shape: f32[1,256], index: 6, kind: input, shape index: {}]   ;;  %s3388_s8 = inlined_call_operand.vmem [shape: f32[1,128], index: 8, kind: input, shape index: {}]   ;;  %s3389_s9 = inlined_call_operand.vmem [shape: f32[1,128], index: 9, kind: input, shape index: {}]   ;;  %s3390_s10 = inlined_call_operand.vmem [shape: f32[1,128], index: 10, kind: input, shape index: {}]   ;;  %s3391_s11 = inlined_call_operand.vmem [shape: f32[256,128], index: 11, kind: output, shape index: {}]  }
   0x1   :  { %v1848_v0 = vld [vmem:[%s3380_s3] sm:$0xf]  ;;  %v2121_v1 = vld [vmem:[%s3380_s3 + $0x4] sm:$0xf0]  ;;  %v2120_v2 = vld [vmem:[%s3380_s3 + $0x4] sm:$0xf] }
   0x2   :  { %v1849_v3 = vor.u32 %v2121_v1, %v1848_v0  ;;  %v1850_v4 = vld [vmem:[%s3380_s3 + $0x8] sm:$0xf0]  ;;  %v103_v5 = vld [vmem:[%s3381_s1 + $0x80] sm:$0xff]  ;;  %v2119_v10 = vld [vmem:[%s3382_s2 + $0x4] sm:$0xf0] }
   0x3   :  { %v104_v6 = vld [vmem:[%s3381_s1 + $0x88] sm:$0xff]  ;;  %v1853_v7 = vor.u32 %v2120_v2, %v1850_v4  ;;  %v1888_v9 = vld [vmem:[%s3382_s2] sm:$0xf]  ;;  %v2118_v11 = vld [vmem:[%s3382_s2 + $0x4] sm:$0xf] }
   0x4   :  { %v127_v8 = vpack.c.bf16 %v104_v6, %v103_v5  ;;  %2170 = vmatpush.bf16.msra.mxu2 %v1849_v3  ;;  %v1889_v12 = vor.u32 %v2119_v10, %v1888_v9  ;;  %v1890_v13 = vld [vmem:[%s3382_s2 + $0x8] sm:$0xf0]  ;;  %205 = vmatpush.bf16.msra.mxu0 %v1849_v3  ;;  %v105_v15 = vld [vmem:[%s3381_s1 + $0x90] sm:$0xff]  ;;  %v106_v16 = vld [vmem:[%s3381_s1 + $0x98] sm:$0xff] }
   0x5   :  { %2171 = vmatpush.bf16.msra.mxu3 %v1853_v7  ;;  %v1893_v14 = vor.u32 %v2118_v11, %v1890_v13  ;;  %294 = vmatpush.bf16.msra.mxu1 %v1853_v7  ;;  %v128_v17 = vpack.c.bf16 %v106_v16, %v105_v15  ;;  %v107_v18 = vld [vmem:[%s3381_s1 + $0xa0] sm:$0xff]  ;;  %v108_v19 = vld [vmem:[%s3381_s1 + $0xa8] sm:$0xff]  ;;  %v109_v21 = vld [vmem:[%s3381_s1 + $0xb0] sm:$0xff] }
   0x6   :  { %v129_v20 = vpack.c.bf16 %v108_v19, %v107_v18  ;;  %v110_v22 = vld [vmem:[%s3381_s1 + $0xb8] sm:$0xff]  ;;  %v111_v24 = vld [vmem:[%s3381_s1 + $0xc0] sm:$0xff]  ;;  %v112_v25 = vld [vmem:[%s3381_s1 + $0xc8] sm:$0xff] }
   0x7   :  { %1862 = vmatmul.msk.bf16.vlgmr.msra.gmra.mxu2 %vm149_vm0, %v127_v8  ;;  %v130_v23 = vpack.c.bf16 %v110_v22, %v109_v21  ;;  %v131_v26 = vpack.c.bf16 %v112_v25, %v111_v24  ;;  %v113_v27 = vld [vmem:[%s3381_s1 + $0xd0] sm:$0xff]  ;;  %v114_v28 = vld [vmem:[%s3381_s1 + $0xd8] sm:$0xff]  ;;  %v87_v30 = vld [vmem:[%s3381_s1] sm:$0xff] }
   0x8   :  { %441 = vmatpush.bf16.msrb.mxu2 %v1889_v12  ;;  %1878 = vmatmul.msk.bf16.vlgmr.msra.gmra.mxu3 %vm149_vm0, %v127_v8  ;;  %v132_v29 = vpack.c.bf16 %v114_v28, %v113_v27  ;;  %v88_v31 = vld [vmem:[%s3381_s1 + $0x8] sm:$0xff]  ;;  %v115_v33 = vld [vmem:[%s3381_s1 + $0xe0] sm:$0xff]  ;;  %v2136_v36 = vld [vmem:[%s3383_s5 + $0x74] sm:$0xf] }
   0x9   :  { %530 = vmatpush.bf16.msrb.mxu3 %v1893_v14  ;;  %v119_v32 = vpack.c.bf16 %v88_v31, %v87_v30  ;;  %v116_v34 = vld [vmem:[%s3381_s1 + $0xe8] sm:$0xff]  ;;  %v1986_v37 = vld [vmem:[%s3383_s5 + $0x78] sm:$0xf0]  ;;  %v2152_v39 = vld [vmem:[%s3383_s5 + $0xf4] sm:$0xf] }
   0xa   :  { %v133_v35 = vpack.c.bf16 %v116_v34, %v115_v33  ;;  %v1989_v38 = vor.u32 %v2136_v36, %v1986_v37  ;;  %v2050_v40 = vld [vmem:[%s3383_s5 + $0xf8] sm:$0xf0]  ;;  %v117_v42 = vld [vmem:[%s3381_s1 + $0xf0] sm:$0xff]  ;;  %v2137_v49 = vld [vmem:[%s3383_s5 + $0x74] sm:$0xf0] }
   0xb   :  { %1854 = vmatmul.msk.bf16.vlgmr.msra.gmra.mxu0 %vm149_vm0, %v119_v32  ;;  %1870 = vmatmul.msk.bf16.vlgmr.msra.gmra.mxu1 %vm149_vm0, %v119_v32  ;;  %v2053_v41 = vor.u32 %v2152_v39, %v2050_v40  ;;  %v118_v43 = vld [vmem:[%s3381_s1 + $0xf8] sm:$0xff]  ;;  %v89_v45 = vld [vmem:[%s3381_s1 + $0x10] sm:$0xff]  ;;  %v39_v54 = vld [vmem:[%s3384_s0] sm:$0xff] }
   0xc   :  { %1154 = vmatpush.bf16.msra.mxu2 %v1989_v38  ;;  %v134_v44 = vpack.c.bf16 %v118_v43, %v117_v42  ;;  %v90_v46 = vld [vmem:[%s3381_s1 + $0x18] sm:$0xff]  ;;  %v1984_v48 = vld [vmem:[%s3383_s5 + $0x70] sm:$0xf]  ;;  %v40_v55 = vld [vmem:[%s3384_s0 + $0x8] sm:$0xff] }
   0xd   :  { %1243 = vmatpush.bf16.msra.mxu3 %v2053_v41  ;;  %v120_v47 = vpack.c.bf16 %v90_v46, %v89_v45  ;;  %v2048_v50 = vld [vmem:[%s3383_s5 + $0xf0] sm:$0xf]  ;;  %v1985_v51 = vor.u32 %v2137_v49, %v1984_v48  ;;  %v2153_v52 = vld [vmem:[%s3383_s5 + $0xf4] sm:$0xf0]  ;;  %v71_v56 = vpack.c.bf16 %v40_v55, %v39_v54  ;;  %v91_v57 = vld [vmem:[%s3381_s1 + $0x20] sm:$0xff] }
   0xe   :  { %v2049_v53 = vor.u32 %v2153_v52, %v2048_v50  ;;  %v92_v58 = vld [vmem:[%s3381_s1 + $0x28] sm:$0xff]  ;;  %v2134_v60 = vld [vmem:[%s3383_s5 + $0x64] sm:$0xf]  ;;  %v1976_v1 = vld [vmem:[%s3383_s5 + $0x60] sm:$0xf] }
   0xf   :  { %976 = vmatpush.bf16.msrb.mxu0 %v1985_v51  ;;  %v121_v59 = vpack.c.bf16 %v92_v58, %v91_v57  ;;  %v1978_v61 = vld [vmem:[%s3383_s5 + $0x68] sm:$0xf0]  ;;  %v2135_v2 = vld [vmem:[%s3383_s5 + $0x64] sm:$0xf0]  ;;  %v2150_v3 = vld [vmem:[%s3383_s5 + $0xe4] sm:$0xf] }
  0x10   :  { %1065 = vmatpush.bf16.msrb.mxu1 %v2049_v53  ;;  %v1981_v62 = vor.u32 %v2134_v60, %v1978_v61  ;;  %v1977_v4 = vor.u32 %v2135_v2, %v1976_v1  ;;  %v2042_v5 = vld [vmem:[%s3383_s5 + $0xe8] sm:$0xf0]  ;;  %v2040_v6 = vld [vmem:[%s3383_s5 + $0xe0] sm:$0xf]  ;;  %v2151_v7 = vld [vmem:[%s3383_s5 + $0xe4] sm:$0xf0] }
  0x11   :  { %v2045_v8 = vor.u32 %v2150_v3, %v2042_v5  ;;  %v2041_v9 = vor.u32 %v2151_v7, %v2040_v6  ;;  %v41_v10 = vld [vmem:[%s3384_s0 + $0x10] sm:$0xff]  ;;  %v42_v11 = vld [vmem:[%s3384_s0 + $0x18] sm:$0xff]  ;;  %v44_v27 = vld [vmem:[%s3384_s0 + $0x28] sm:$0xff] }
  0x12   :  { %1155 = vmatpush.bf16.msra.mxu2 %v1981_v62  ;;  %v72_v14 = vpack.c.bf16 %v42_v11, %v41_v10  ;;  %v93_v15 = vld [vmem:[%s3381_s1 + $0x30] sm:$0xff]  ;;  %v94_v16 = vld [vmem:[%s3381_s1 + $0x38] sm:$0xff]  ;;  %v95_v31 = vld [vmem:[%s3381_s1 + $0x40] sm:$0xff] }
  0x13   :  { %977 = vmatpush.bf16.msrb.mxu0 %v1977_v4  ;;  %1244 = vmatpush.bf16.msra.mxu3 %v2045_v8  ;;  %v2133_v21 = vld [vmem:[%s3383_s5 + $0x54] sm:$0xf0]  ;;  %v2032_v22 = vld [vmem:[%s3383_s5 + $0xd0] sm:$0xf]  ;;  %v96_v32 = vld [vmem:[%s3381_s1 + $0x48] sm:$0xff] }
  0x14   :  { %1066 = vmatpush.bf16.msrb.mxu1 %v2041_v9  ;;  %v2149_v24 = vld [vmem:[%s3383_s5 + $0xd4] sm:$0xf0]  ;;  %v123_v33 = vpack.c.bf16 %v96_v32, %v95_v31  ;;  %v2132_v34 = vld [vmem:[%s3383_s5 + $0x54] sm:$0xf]  ;;  %v1960_v39 = vld [vmem:[%s3383_s5 + $0x40] sm:$0xf] }
  0x15   :  { %v2033_v25 = vor.u32 %v2149_v24, %v2032_v22  ;;  %v2131_v40 = vld [vmem:[%s3383_s5 + $0x44] sm:$0xf0]  ;;  %v2148_v41 = vld [vmem:[%s3383_s5 + $0xd4] sm:$0xf]  ;;  %v2034_v43 = vld [vmem:[%s3383_s5 + $0xd8] sm:$0xf0] }
  0x16   :  { %v1961_v42 = vor.u32 %v2131_v40, %v1960_v39  ;;  %v2147_v45 = vld [vmem:[%s3383_s5 + $0xc4] sm:$0xf0]  ;;  %v2037_v46 = vor.u32 %v2148_v41, %v2034_v43  ;;  %v45_v48 = vld [vmem:[%s3384_s0 + $0x30] sm:$0xff]  ;;  %v46_v49 = vld [vmem:[%s3384_s0 + $0x38] sm:$0xff] }
  0x17   :  { %1863 = vmatmul.msk.bf16.gmra.mxu2 %vm149_vm0, %v128_v17  ;;  %v74_v52 = vpack.c.bf16 %v46_v49, %v45_v48  ;;  %v97_v53 = vld [vmem:[%s3381_s1 + $0x50] sm:$0xff]  ;;  %v98_v54 = vld [vmem:[%s3381_s1 + $0x58] sm:$0xff]  ;;  %v47_v2 = vld [vmem:[%s3384_s0 + $0x40] sm:$0xff] }
  0x18   :  { %1879 = vmatmul.msk.bf16.gmra.mxu3 %vm149_vm0, %v128_v17  ;;  %v122_v17 = vpack.c.bf16 %v94_v16, %v93_v15  ;;  %1067 = vmatpush.bf16.msrb.mxu1 %v2033_v25  ;;  %v124_v55 = vpack.c.bf16 %v98_v54, %v97_v53  ;;  %v1952_v58 = vld [vmem:[%s3383_s5 + $0x30] sm:$0xf]  ;;  %v2145_v62 = vld [vmem:[%s3383_s5 + $0xb4] sm:$0xf0]  ;;  %v48_v3 = vld [vmem:[%s3384_s0 + $0x48] sm:$0xff] }
  0x19   :  { %1245 = vmatpush.bf16.msra.mxu3 %v2037_v46  ;;  %v2016_v60 = vld [vmem:[%s3383_s5 + $0xb0] sm:$0xf]  ;;  %v75_v6 = vpack.c.bf16 %v48_v3, %v47_v2  ;;  %v99_v7 = vld [vmem:[%s3381_s1 + $0x60] sm:$0xff]  ;;  %v100_v8 = vld [vmem:[%s3381_s1 + $0x68] sm:$0xff] }
  0x1a   :  { %v2017_v1 = vor.u32 %v2145_v62, %v2016_v60  ;;  %v125_v9 = vpack.c.bf16 %v100_v8, %v99_v7  ;;  %v2130_v10 = vld [vmem:[%s3383_s5 + $0x44] sm:$0xf]  ;;  %v1962_v11 = vld [vmem:[%s3383_s5 + $0x48] sm:$0xf0]  ;;  %v2008_v24 = vld [vmem:[%s3383_s5 + $0xa0] sm:$0xf] }
  0x1b   :  { %1855 = vmatmul.msk.bf16.gmra.mxu0 %vm149_vm0, %v120_v47  ;;  %1871 = vmatmul.msk.bf16.gmra.mxu1 %vm149_vm0, %v120_v47  ;;  %v2143_v25 = vld [vmem:[%s3383_s5 + $0xa4] sm:$0xf0]  ;;  %v50_v31 = vld [vmem:[%s3384_s0 + $0x58] sm:$0xff]  ;;  %v51_v48 = vld [vmem:[%s3384_s0 + $0x60] sm:$0xff] }
  0x1c   :  { %v2125_v43 = vld [vmem:[%s3383_s5 + $0x14] sm:$0xf0]  ;;  %v52_v49 = vld [vmem:[%s3384_s0 + $0x68] sm:$0xff]  ;;  %v53_v2 = vld [vmem:[%s3384_s0 + $0x70] sm:$0xff] }
  0x1d   :  { %v2141_v46 = vld [vmem:[%s3383_s5 + $0x94] sm:$0xf0]  ;;  %v77_v54 = vpack.c.bf16 %v52_v49, %v51_v48  ;;  %v2123_v7 = vld [vmem:[%s3383_s5 + $0x4] sm:$0xf0]  ;;  %v2144_v8 = vld [vmem:[%s3383_s5 + $0xb4] sm:$0xf] }
  0x1e   :  { %v54_v3 = vld [vmem:[%s3384_s0 + $0x78] sm:$0xff] }
  0x27   :  { %1864 = vmatmul.msk.bf16.gmra.mxu2 %vm149_vm0, %v129_v20 }
  0x28   :  { %1880 = vmatmul.msk.bf16.gmra.mxu3 %vm149_vm0, %v129_v20  ;;  %v1968_v20 = vld [vmem:[%s3383_s5 + $0x50] sm:$0xf] }
  0x2b   :  { %1856 = vmatmul.msk.bf16.gmra.mxu0 %vm149_vm0, %v121_v59  ;;  %1872 = vmatmul.msk.bf16.gmra.mxu1 %vm149_vm0, %v121_v59  ;;  %v2129_v59 = vld [vmem:[%s3383_s5 + $0x34] sm:$0xf0] }
  0x2c   :  { %v1953_v61 = vor.u32 %v2129_v59, %v1952_v58  ;;  %v1954_v58 = vld [vmem:[%s3383_s5 + $0x38] sm:$0xf0] }
  0x37   :  { %1865 = vmatmul.msk.bf16.gmra.mxu2 %vm149_vm0, %v130_v23 }
  0x38   :  { %1881 = vmatmul.msk.bf16.gmra.mxu3 %vm149_vm0, %v130_v23  ;;  %v1969_v23 = vor.u32 %v2133_v21, %v1968_v20  ;;  %v2127_v20 = vld [vmem:[%s3383_s5 + $0x24] sm:$0xf0]  ;;  %v2146_v21 = vld [vmem:[%s3383_s5 + $0xc4] sm:$0xf] }
  0x3a   :  { %978 = vmatpush.bf16.msrb.mxu0 %v1969_v23  ;;  %v2026_v23 = vld [vmem:[%s3383_s5 + $0xc8] sm:$0xf0] }
  0x3b   :  { %1857 = vmatmul.msk.bf16.gmra.mxu0 %vm149_vm0, %v122_v17  ;;  %1873 = vmatmul.msk.bf16.gmra.mxu1 %vm149_vm0, %v122_v17  ;;  %v1944_v17 = vld [vmem:[%s3383_s5 + $0x20] sm:$0xf] }
  0x3c   :  { %v1945_v22 = vor.u32 %v2127_v20, %v1944_v17 }
  0x3e   :  { %979 = vmatpush.bf16.msrb.mxu0 %v1961_v42  ;;  %v1936_v42 = vld [vmem:[%s3383_s5 + $0x10] sm:$0xf] }
  0x42   :  { %980 = vmatpush.bf16.msrb.mxu0 %v1953_v61 }
  0x46   :  { %981 = vmatpush.bf16.msrb.mxu0 %v1945_v22 }
  0x47   :  { %1866 = vmatmul.msk.bf16.gmra.mxu2 %vm149_vm0, %v131_v26 }
  0x48   :  { %1882 = vmatmul.msk.bf16.gmra.mxu3 %vm149_vm0, %v131_v26  ;;  %v43_v26 = vld [vmem:[%s3384_s0 + $0x20] sm:$0xff] }
  0x49   :  { %v73_v30 = vpack.c.bf16 %v44_v27, %v43_v26  ;;  %v2029_v26 = vor.u32 %v2146_v21, %v2026_v23  ;;  %v2009_v27 = vor.u32 %v2143_v25, %v2008_v24  ;;  %v78_v23 = vpack.c.bf16 %v54_v3, %v53_v2  ;;  %v57_v3 = vld [vmem:[%s3384_s0 + $0x90] sm:$0xff] }
  0x4b   :  { %1858 = vmatmul.msk.bf16.gmra.mxu0 %vm149_vm0, %v123_v33  ;;  %1874 = vmatmul.msk.bf16.gmra.mxu1 %vm149_vm0, %v123_v33 }
  0x4c   :  { %1246 = vmatpush.bf16.msra.mxu3 %v2029_v26 }
  0x57   :  { %1867 = vmatmul.msk.bf16.gmra.mxu2 %vm149_vm0, %v132_v29 }
  0x58   :  { %1883 = vmatmul.msk.bf16.gmra.mxu3 %vm149_vm0, %v132_v29 }
  0x5b   :  { %1859 = vmatmul.msk.bf16.gmra.mxu0 %vm149_vm0, %v124_v55  ;;  %1875 = vmatmul.msk.bf16.gmra.mxu1 %vm149_vm0, %v124_v55  ;;  %v2128_v55 = vld [vmem:[%s3383_s5 + $0x34] sm:$0xf] }
  0x5c   :  { %v1957_v59 = vor.u32 %v2128_v55, %v1954_v58  ;;  %v612_v58 = vld [vmem:[%s3386_s4] sm:$0x3] }
  0x5d   :  { %v2694_v2 = vperm.slane %v612_v58, 0 }
  0x67   :  { %1868 = vmatmul.msk.bf16.gmra.mxu2 %vm149_vm0, %v133_v35 }
  0x68   :  { %1884 = vmatmul.msk.bf16.gmra.mxu3 %vm149_vm0, %v133_v35  ;;  %v1970_v35 = vld [vmem:[%s3383_s5 + $0x58] sm:$0xf0] }
  0x69   :  { %v1973_v36 = vor.u32 %v2132_v34, %v1970_v35  ;;  %v101_v35 = vld [vmem:[%s3381_s1 + $0x70] sm:$0xff] }
  0x6b   :  { %1156 = vmatpush.bf16.msra.mxu2 %v1973_v36  ;;  %1860 = vmatmul.msk.bf16.gmra.mxu0 %vm149_vm0, %v125_v9  ;;  %v102_v36 = vld [vmem:[%s3381_s1 + $0x78] sm:$0xff] }
  0x6c   :  { %1876 = vmatmul.msk.bf16.gmra.mxu1 %vm149_vm0, %v125_v9  ;;  %v126_v39 = vpack.c.bf16 %v102_v36, %v101_v35  ;;  %v2161_v35 = vld [vmem:[%s3385_s7 + $0x38] sm:$0xff] }
  0x6d   :  { %v2169_v36 = vld [vmem:[%s3385_s7 + $0x78] sm:$0xff] }
  0x77   :  { %1869 = vmatmul.msk.bf16.gmra.mxu2 %vm149_vm0, %v134_v44 }
  0x78   :  { %1885 = vmatmul.msk.bf16.gmra.mxu3 %vm149_vm0, %v134_v44  ;;  %v2024_v44 = vld [vmem:[%s3383_s5 + $0xc0] sm:$0xf] }
  0x79   :  { %v2025_v47 = vor.u32 %v2147_v45, %v2024_v44  ;;  %v2000_v44 = vld [vmem:[%s3383_s5 + $0x90] sm:$0xf]  ;;  %v1937_v45 = vor.u32 %v2125_v43, %v1936_v42 }
  0x7b   :  { %1068 = vmatpush.bf16.msrb.mxu1 %v2025_v47  ;;  %1861 = vmatmul.msk.bf16.gmra.mxu0 %vm149_vm0, %v126_v39  ;;  %v2001_v47 = vor.u32 %v2141_v46, %v2000_v44  ;;  %v1946_v46 = vld [vmem:[%s3383_s5 + $0x28] sm:$0xf0] }
  0x7c   :  { %1877 = vmatmul.msk.bf16.gmra.mxu1 %vm149_vm0, %v126_v39  ;;  %982 = vmatpush.bf16.msrb.mxu0 %v1937_v45  ;;  %v2126_v45 = vld [vmem:[%s3383_s5 + $0x24] sm:$0xf] }
  0x7f   :  { %1069 = vmatpush.bf16.msrb.mxu1 %v2017_v1 }
  0x83   :  { %1070 = vmatpush.bf16.msrb.mxu1 %v2009_v27 }
  0x87   :  { %1894 = vmatmul.msk.bf16.vlgmr.msrb.gmra.mxu2 %vm149_vm0, %v71_v56  ;;  %1071 = vmatpush.bf16.msrb.mxu1 %v2001_v47  ;;  %v1949_v47 = vor.u32 %v2126_v45, %v1946_v46 }
  0x88   :  { %1910 = vmatmul.msk.bf16.vlgmr.msrb.gmra.mxu3 %vm149_vm0, %v71_v56  ;;  %v207_v62 = vpop.f32.mrf.mxu0  ;;  %v296_v1 = vpop.f32.mrf.mxu1 }
  0x8a   :  { %v2385_v63 = vpop.f32.mrf.mxu2 }
  0x8b   :  { %v2387_v0 = vpop.f32.mrf.mxu3 }
  0x90   :  { %v209_v24 = vpop.f32.mrf.mxu0  ;;  %v298_v25 = vpop.f32.mrf.mxu1 }
  0x92   :  { %v2413_v12 = vpop.f32.mrf.mxu2 }
  0x93   :  { %v2415_v13 = vpop.f32.mrf.mxu3 }
  0x97   :  { %1895 = vmatmul.msk.bf16.gmra.mxu2 %vm149_vm0, %v72_v14 }
  0x98   :  { %1911 = vmatmul.msk.bf16.gmra.mxu3 %vm149_vm0, %v72_v14  ;;  %v1965_v14 = vor.u32 %v2130_v10, %v1962_v11  ;;  %v2018_v10 = vld [vmem:[%s3383_s5 + $0xb8] sm:$0xf0]  ;;  %v1992_v11 = vld [vmem:[%s3383_s5 + $0x80] sm:$0xf]  ;;  %v301_v39 = vpop.f32.mrf.mxu1 }
  0x99   :  { %v2021_v20 = vor.u32 %v2144_v8, %v2018_v10  ;;  %v58_v8 = vld [vmem:[%s3384_s0 + $0x98] sm:$0xff] }
  0x9a   :  { %v2427_v18 = vpop.f32.mrf.mxu2  ;;  %1157 = vmatpush.bf16.msra.mxu2 %v1965_v14  ;;  %v2139_v14 = vld [vmem:[%s3383_s5 + $0x84] sm:$0xf0] }
  0x9b   :  { %v2429_v19 = vpop.f32.mrf.mxu3  ;;  %v1993_v21 = vor.u32 %v2139_v14, %v1992_v11  ;;  %1247 = vmatpush.bf16.msra.mxu3 %v2021_v20 }
  0x9d   :  { %1072 = vmatpush.bf16.msrb.mxu1 %v1993_v21  ;;  %v80_v21 = vpack.c.bf16 %v58_v8, %v57_v3 }
  0x9e   :  { %1158 = vmatpush.bf16.msra.mxu2 %v1957_v59 }
  0xa0   :  { %v303_v55 = vpop.f32.mrf.mxu1 }
  0xa1   :  { %1649 = vmatpush.bf16.msra.mxu1 %v2169_v36 }
  0xa2   :  { %v2449_v28 = vpop.f32.mrf.mxu2  ;;  %1159 = vmatpush.bf16.msra.mxu2 %v1949_v47 }
  0xa3   :  { %v2451_v29 = vpop.f32.mrf.mxu3 }
  0xa7   :  { %1896 = vmatmul.msk.bf16.gmra.mxu2 %vm149_vm0, %v73_v30 }
  0xa8   :  { %1912 = vmatmul.msk.bf16.gmra.mxu3 %vm149_vm0, %v73_v30  ;;  %v49_v30 = vld [vmem:[%s3384_s0 + $0x50] sm:$0xff]  ;;  %v306_v36 = vpop.f32.mrf.mxu1 }
  0xa9   :  { %v76_v34 = vpack.c.bf16 %v50_v31, %v49_v30  ;;  %v55_v30 = vld [vmem:[%s3384_s0 + $0x80] sm:$0xff]  ;;  %v56_v31 = vld [vmem:[%s3384_s0 + $0x88] sm:$0xff] }
  0xaa   :  { %v2469_v37 = vpop.f32.mrf.mxu2  ;;  %v79_v44 = vpack.c.bf16 %v56_v31, %v55_v30 }
  0xab   :  { %v2471_v38 = vpop.f32.mrf.mxu3 }
  0xb0   :  { %v308_v8 = vpop.f32.mrf.mxu1 }
  0xb2   :  { %v2497_v50 = vpop.f32.mrf.mxu2 }
  0xb3   :  { %v2499_v51 = vpop.f32.mrf.mxu3 }
  0xb7   :  { %1897 = vmatmul.msk.bf16.gmra.mxu2 %vm149_vm0, %v74_v52 }
  0xb8   :  { %1913 = vmatmul.msk.bf16.gmra.mxu3 %vm149_vm0, %v74_v52 }
  0xba   :  { %v2511_v56 = vpop.f32.mrf.mxu2 }
  0xbb   :  { %v2513_v57 = vpop.f32.mrf.mxu3 }
  0xc2   :  { %v2533_v4 = vpop.f32.mrf.mxu2 }
  0xc3   :  { %v2535_v5 = vpop.f32.mrf.mxu3 }
  0xc7   :  { %1898 = vmatmul.msk.bf16.gmra.mxu2 %vm149_vm0, %v75_v6 }
  0xc8   :  { %1914 = vmatmul.msk.bf16.gmra.mxu3 %vm149_vm0, %v75_v6  ;;  %v1928_v6 = vld [vmem:[%s3383_s5] sm:$0xf] }
  0xc9   :  { %v1929_v9 = vor.u32 %v2123_v7, %v1928_v6  ;;  %v2699_v7 = vperm.slane %v612_v58, 1 }
  0xca   :  { %v2553_v15 = vpop.f32.mrf.mxu2 }
  0xcb   :  { %v2555_v16 = vpop.f32.mrf.mxu3  ;;  %983 = vmatpush.bf16.msrb.mxu0 %v1929_v9  ;;  %v2142_v9 = vld [vmem:[%s3383_s5 + $0xa4] sm:$0xf] }
  0xcf   :  { %1560 = vmatpush.bf16.msra.mxu0 %v2161_v35 }
  0xd2   :  { %v2581_v32 = vpop.f32.mrf.mxu2 }
  0xd3   :  { %v2583_v33 = vpop.f32.mrf.mxu3 }
  0xd7   :  { %1899 = vmatmul.msk.bf16.gmra.mxu2 %vm149_vm0, %v76_v34 }
  0xd8   :  { %1915 = vmatmul.msk.bf16.gmra.mxu3 %vm149_vm0, %v76_v34  ;;  %v212_v34 = vpop.f32.mrf.mxu0 }
  0xda   :  { %v2595_v40 = vpop.f32.mrf.mxu2 }
  0xdb   :  { %v2597_v41 = vpop.f32.mrf.mxu3 }
  0xe0   :  { %v214_v49 = vpop.f32.mrf.mxu0 }
  0xe2   :  { %v2617_v52 = vpop.f32.mrf.mxu2 }
  0xe3   :  { %v2619_v53 = vpop.f32.mrf.mxu3 }
  0xe7   :  { %1900 = vmatmul.msk.bf16.gmra.mxu2 %vm149_vm0, %v77_v54 }
  0xe8   :  { %1916 = vmatmul.msk.bf16.gmra.mxu3 %vm149_vm0, %v77_v54  ;;  %v217_v31 = vpop.f32.mrf.mxu0 }
  0xea   :  { %v2629_v60 = vpop.f32.mrf.mxu2 }
  0xeb   :  { %v2631_v61 = vpop.f32.mrf.mxu3 }
  0xf2   :  { %v2657_v17 = vpop.f32.mrf.mxu2 }
  0xf3   :  { %v2659_v22 = vpop.f32.mrf.mxu3 }
  0xf7   :  { %1901 = vmatmul.msk.bf16.gmra.mxu2 %vm149_vm0, %v78_v23 }
  0xf8   :  { %1917 = vmatmul.msk.bf16.gmra.mxu3 %vm149_vm0, %v78_v23 }
  0xfa   :  { %v2663_v26 = vpop.f32.mrf.mxu2 }
  0xfb   :  { %v2665_v27 = vpop.f32.mrf.mxu3 }
 0x102   :  { %v2679_v42 = vpop.f32.mrf.mxu2 }
 0x103   :  { %3392 = vst [vmem:[#allocation2_spill] sm:$0xff] %v2679_v42  ;;  %v2681_v43 = vpop.f32.mrf.mxu3 }
 0x104   :  { %3393 = vst [vmem:[#allocation3_spill] sm:$0xff] %v2681_v43 }
 0x107   :  { %1902 = vmatmul.msk.bf16.gmra.mxu2 %vm149_vm0, %v79_v44 }
 0x108   :  { %1918 = vmatmul.msk.bf16.gmra.mxu3 %vm149_vm0, %v79_v44 }
 0x10a   :  { %v443_v48 = vpop.f32.mrf.mxu2 }
 0x10b   :  { %v532_v54 = vpop.f32.mrf.mxu3  ;;  %v444_v59 = vadd.f32 %v443_v48, %v207_v62  ;;  %v2010_v62 = vld [vmem:[%s3383_s5 + $0xa8] sm:$0xf0] }
 0x10c   :  { %v533_v6 = vadd.f32 %v532_v54, %v296_v1  ;;  %v2013_v10 = vor.u32 %v2142_v9, %v2010_v62  ;;  %v60_v62 = vld [vmem:[%s3384_s0 + $0xa8] sm:$0xff] }
 0x10d   :  { %v618_v14 = vadd.f32 %v2694_v2, %v444_v59  ;;  %v219_v59 = vpop.f32.mrf.mxu0 }
 0x10e   :  { %1248 = vmatpush.bf16.msra.mxu3 %v2013_v10  ;;  %v619_v23 = vadd.f32 %v2699_v7, %v533_v6  ;;  %v59_v6 = vld [vmem:[%s3384_s0 + $0xa0] sm:$0xff]  ;;  %v2160_v10 = vld [vmem:[%s3385_s7 + $0x30] sm:$0xff] }
 0x10f   :  { %v682_v45 = vmax.f32 %v618_v14, 0.0  ;;  %1561 = vmatpush.bf16.msra.mxu0 %v2160_v10 }
 0x110   :  { %v683_v47 = vmax.f32 %v619_v23, 0.0 }
 0x112   :  { %v445_v11 = vpop.f32.mrf.mxu2 }
 0x113   :  { %v446_v20 = vadd.f32 %v445_v11, %v209_v24  ;;  %v534_v1 = vpop.f32.mrf.mxu3  ;;  %v2168_v11 = vld [vmem:[%s3385_s7 + $0x70] sm:$0xff] }
 0x114   :  { %v535_v30 = vadd.f32 %v534_v1, %v298_v25  ;;  %1650 = vmatpush.bf16.msra.mxu1 %v2168_v11  ;;  %v61_v11 = vld [vmem:[%s3384_s0 + $0xb0] sm:$0xff] }
 0x115   :  { %v620_v35 = vadd.f32 %v2694_v2, %v446_v20 }
 0x116   :  { %v621_v44 = vadd.f32 %v2699_v7, %v535_v30 }
 0x117   :  { %v684_v46 = vmax.f32 %v620_v35, 0.0  ;;  %1903 = vmatmul.msk.bf16.gmra.mxu2 %vm149_vm0, %v80_v21 }
 0x118   :  { %v685_v48 = vmax.f32 %v621_v44, 0.0  ;;  %1919 = vmatmul.msk.bf16.gmra.mxu3 %vm149_vm0, %v80_v21 }
 0x119   :  { %v2716_v24 = vpack.c.bf16 %v684_v46, %v682_v45 }
 0x11a   :  { %v448_v54 = vpop.f32.mrf.mxu2  ;;  %v2718_v58 = vpack.c.bf16 %v685_v48, %v683_v47  ;;  %v222_v48 = vpop.f32.mrf.mxu0 }
 0x11b   :  { %v537_v25 = vpop.f32.mrf.mxu3  ;;  %984 = vmatmul.bf16.vlgmr.msrb.gmra.mxu0 %v2716_v24  ;;  %v449_v3 = vadd.f32 %v448_v54, %v212_v34 }
 0x11c   :  { %1073 = vmatmul.bf16.vlgmr.msrb.gmra.mxu1 %v2718_v58  ;;  %v538_v9 = vadd.f32 %v537_v25, %v301_v39  ;;  %v81_v39 = vpack.c.bf16 %v60_v62, %v59_v6  ;;  %v311_v25 = vpop.f32.mrf.mxu1 }
 0x11d   :  { %v622_v34 = vadd.f32 %v2694_v2, %v449_v3 }
 0x11e   :  { %v623_v21 = vadd.f32 %v2699_v7, %v538_v9 }
 0x11f   :  { %v686_v44 = vmax.f32 %v622_v34, 0.0  ;;  %v62_v34 = vld [vmem:[%s3384_s0 + $0xb8] sm:$0xff] }
 0x120   :  { %v687_v46 = vmax.f32 %v623_v21, 0.0 }
 0x122   :  { %v450_v14 = vpop.f32.mrf.mxu2 }
 0x123   :  { %v451_v20 = vadd.f32 %v450_v14, %v214_v49  ;;  %v539_v1 = vpop.f32.mrf.mxu3  ;;  %v2124_v49 = vld [vmem:[%s3383_s5 + $0x14] sm:$0xf] }
 0x124   :  { %v540_v23 = vadd.f32 %v539_v1, %v303_v55  ;;  %v1938_v55 = vld [vmem:[%s3383_s5 + $0x18] sm:$0xf0] }
 0x125   :  { %v624_v30 = vadd.f32 %v2694_v2, %v451_v20  ;;  %v1941_v3 = vor.u32 %v2124_v49, %v1938_v55  ;;  %v2140_v20 = vld [vmem:[%s3383_s5 + $0x94] sm:$0xf]  ;;  %v2002_v1 = vld [vmem:[%s3383_s5 + $0x98] sm:$0xf0] }
 0x126   :  { %v625_v35 = vadd.f32 %v2699_v7, %v540_v23 }
 0x127   :  { %1904 = vmatmul.msk.bf16.gmra.mxu2 %vm149_vm0, %v81_v39  ;;  %v688_v45 = vmax.f32 %v624_v30, 0.0 }
 0x128   :  { %1920 = vmatmul.msk.bf16.gmra.mxu3 %vm149_vm0, %v81_v39  ;;  %v689_v47 = vmax.f32 %v625_v35, 0.0  ;;  %1160 = vmatpush.bf16.msra.mxu2 %v1941_v3  ;;  %v2005_v39 = vor.u32 %v2140_v20, %v2002_v1  ;;  %v63_v1 = vld [vmem:[%s3384_s0 + $0xc0] sm:$0xff] }
 0x129   :  { %v2746_v54 = vpack.c.bf16 %v688_v45, %v686_v44  ;;  %v313_v44 = vpop.f32.mrf.mxu1 }
 0x12a   :  { %v453_v6 = vpop.f32.mrf.mxu2  ;;  %v2748_v9 = vpack.c.bf16 %v689_v47, %v687_v46  ;;  %1249 = vmatpush.bf16.msra.mxu3 %v2005_v39 }
 0x12b   :  { %v542_v62 = vpop.f32.mrf.mxu3  ;;  %989 = vmatmul.bf16.gmra.mxu0 %v2746_v54  ;;  %v454_v10 = vadd.f32 %v453_v6, %v217_v31  ;;  %v224_v31 = vpop.f32.mrf.mxu0 }
 0x12c   :  { %1078 = vmatmul.bf16.gmra.mxu1 %v2748_v9  ;;  %v543_v14 = vadd.f32 %v542_v62, %v306_v36  ;;  %v82_v36 = vpack.c.bf16 %v62_v34, %v61_v11 }
 0x12d   :  { %v626_v23 = vadd.f32 %v2694_v2, %v454_v10 }
 0x12e   :  { %v627_v45 = vadd.f32 %v2699_v7, %v543_v14 }
 0x12f   :  { %v690_v55 = vmax.f32 %v626_v23, 0.0  ;;  %v2159_v23 = vld [vmem:[%s3385_s7 + $0x28] sm:$0xff] }
 0x130   :  { %v691_v6 = vmax.f32 %v627_v45, 0.0  ;;  %1562 = vmatpush.bf16.msra.mxu0 %v2159_v23 }
 0x131   :  { %v316_v14 = vpop.f32.mrf.mxu1 }
 0x132   :  { %v455_v21 = vpop.f32.mrf.mxu2 }
 0x133   :  { %v456_v30 = vadd.f32 %v455_v21, %v219_v59  ;;  %v544_v35 = vpop.f32.mrf.mxu3  ;;  %v64_v21 = vld [vmem:[%s3384_s0 + $0xc8] sm:$0xff] }
 0x134   :  { %v545_v46 = vadd.f32 %v544_v35, %v308_v8  ;;  %v227_v8 = vpop.f32.mrf.mxu0 }
 0x135   :  { %v628_v47 = vadd.f32 %v2694_v2, %v456_v30  ;;  %v2167_v30 = vld [vmem:[%s3385_s7 + $0x68] sm:$0xff] }
 0x136   :  { %v629_v49 = vadd.f32 %v2699_v7, %v545_v46  ;;  %1651 = vmatpush.bf16.msra.mxu1 %v2167_v30 }
 0x137   :  { %1905 = vmatmul.msk.bf16.gmra.mxu2 %vm149_vm0, %v82_v36  ;;  %v692_v3 = vmax.f32 %v628_v47, 0.0 }
 0x138   :  { %1921 = vmatmul.msk.bf16.gmra.mxu3 %vm149_vm0, %v82_v36  ;;  %v693_v62 = vmax.f32 %v629_v49, 0.0 }
 0x139   :  { %v2770_v59 = vpack.c.bf16 %v692_v3, %v690_v55 }
 0x13a   :  { %v458_v10 = vpop.f32.mrf.mxu2  ;;  %v2772_v11 = vpack.c.bf16 %v693_v62, %v691_v6 }
 0x13b   :  { %v547_v34 = vpop.f32.mrf.mxu3  ;;  %994 = vmatmul.bf16.gmra.mxu0 %v2770_v59  ;;  %v459_v20 = vadd.f32 %v458_v10, %v222_v48  ;;  %v318_v10 = vpop.f32.mrf.mxu1 }
 0x13c   :  { %1083 = vmatmul.bf16.gmra.mxu1 %v2772_v11  ;;  %v548_v39 = vadd.f32 %v547_v34, %v311_v25  ;;  %v83_v25 = vpack.c.bf16 %v64_v21, %v63_v1  ;;  %v229_v3 = vpop.f32.mrf.mxu0 }
 0x13d   :  { %v630_v48 = vadd.f32 %v2694_v2, %v459_v20 }
 0x13e   :  { %v631_v46 = vadd.f32 %v2699_v7, %v548_v39 }
 0x13f   :  { %v694_v6 = vmax.f32 %v630_v48, 0.0  ;;  %v65_v48 = vld [vmem:[%s3384_s0 + $0xd0] sm:$0xff] }
 0x140   :  { %v695_v34 = vmax.f32 %v631_v46, 0.0  ;;  %v2138_v46 = vld [vmem:[%s3383_s5 + $0x84] sm:$0xf] }
 0x142   :  { %v460_v35 = vpop.f32.mrf.mxu2 }
 0x143   :  { %v461_v36 = vadd.f32 %v460_v35, %v224_v31  ;;  %v549_v45 = vpop.f32.mrf.mxu3  ;;  %v2122_v31 = vld [vmem:[%s3383_s5 + $0x4] sm:$0xf] }
 0x144   :  { %v550_v47 = vadd.f32 %v549_v45, %v313_v44  ;;  %v1930_v44 = vld [vmem:[%s3383_s5 + $0x8] sm:$0xf0]  ;;  %v232_v45 = vpop.f32.mrf.mxu0 }
 0x145   :  { %v632_v49 = vadd.f32 %v2694_v2, %v461_v36  ;;  %v1933_v39 = vor.u32 %v2122_v31, %v1930_v44 }
 0x146   :  { %v633_v55 = vadd.f32 %v2699_v7, %v550_v47  ;;  %v1994_v47 = vld [vmem:[%s3383_s5 + $0x88] sm:$0xf0] }
 0x147   :  { %1906 = vmatmul.msk.bf16.gmra.mxu2 %vm149_vm0, %v83_v25  ;;  %v696_v62 = vmax.f32 %v632_v49, 0.0  ;;  %v321_v49 = vpop.f32.mrf.mxu1 }
 0x148   :  { %1922 = vmatmul.msk.bf16.gmra.mxu3 %vm149_vm0, %v83_v25  ;;  %v697_v20 = vmax.f32 %v633_v55, 0.0  ;;  %1161 = vmatpush.bf16.msra.mxu2 %v1933_v39  ;;  %v66_v25 = vld [vmem:[%s3384_s0 + $0xd8] sm:$0xff] }
 0x149   :  { %v2800_v1 = vpack.c.bf16 %v696_v62, %v694_v6 }
 0x14a   :  { %v463_v21 = vpop.f32.mrf.mxu2  ;;  %v2802_v23 = vpack.c.bf16 %v697_v20, %v695_v34  ;;  %v84_v34 = vpack.c.bf16 %v66_v25, %v65_v48 }
 0x14b   :  { %v552_v30 = vpop.f32.mrf.mxu3  ;;  %999 = vmatmul.bf16.gmra.mxu0 %v2800_v1  ;;  %v464_v35 = vadd.f32 %v463_v21, %v227_v8  ;;  %v1997_v8 = vor.u32 %v2138_v46, %v1994_v47 }
 0x14c   :  { %1088 = vmatmul.bf16.gmra.mxu1 %v2802_v23  ;;  %v553_v36 = vadd.f32 %v552_v30, %v316_v14 }
 0x14d   :  { %v634_v6 = vadd.f32 %v2694_v2, %v464_v35  ;;  %1250 = vmatpush.bf16.msra.mxu3 %v1997_v8  ;;  %v67_v8 = vld [vmem:[%s3384_s0 + $0xe0] sm:$0xff] }
 0x14e   :  { %v635_v20 = vadd.f32 %v2699_v7, %v553_v36 }
 0x14f   :  { %v698_v21 = vmax.f32 %v634_v6, 0.0  ;;  %v68_v6 = vld [vmem:[%s3384_s0 + $0xe8] sm:$0xff] }
 0x150   :  { %v699_v43 = vmax.f32 %v635_v20, 0.0 }
 0x152   :  { %v465_v55 = vpop.f32.mrf.mxu2 }
 0x153   :  { %v466_v62 = vadd.f32 %v465_v55, %v229_v3  ;;  %v554_v14 = vpop.f32.mrf.mxu3  ;;  %v234_v3 = vpop.f32.mrf.mxu0 }
 0x154   :  { %v555_v31 = vadd.f32 %v554_v14, %v318_v10  ;;  %v323_v10 = vpop.f32.mrf.mxu1 }
 0x155   :  { %v636_v44 = vadd.f32 %v2694_v2, %v466_v62  ;;  %v2166_v62 = vld [vmem:[%s3385_s7 + $0x60] sm:$0xff] }
 0x156   :  { %v637_v39 = vadd.f32 %v2699_v7, %v555_v31  ;;  %1652 = vmatpush.bf16.msra.mxu1 %v2166_v62 }
 0x157   :  { %v700_v30 = vmax.f32 %v636_v44, 0.0  ;;  %1907 = vmatmul.msk.bf16.gmra.mxu2 %vm149_vm0, %v84_v34 }
 0x158   :  { %v701_v46 = vmax.f32 %v637_v39, 0.0  ;;  %1923 = vmatmul.msk.bf16.gmra.mxu3 %vm149_vm0, %v84_v34 }
 0x159   :  { %v2824_v35 = vpack.c.bf16 %v700_v30, %v698_v21 }
 0x15a   :  { %v468_v48 = vpop.f32.mrf.mxu2  ;;  %v2826_v25 = vpack.c.bf16 %v701_v46, %v699_v43  ;;  %v2158_v43 = vld [vmem:[%s3385_s7 + $0x20] sm:$0xff] }
 0x15b   :  { %v557_v36 = vpop.f32.mrf.mxu3  ;;  %1004 = vmatmul.bf16.gmra.mxu0 %v2824_v35  ;;  %v469_v47 = vadd.f32 %v468_v48, %v232_v45  ;;  %v237_v44 = vpop.f32.mrf.mxu0 }
 0x15c   :  { %1093 = vmatmul.bf16.gmra.mxu1 %v2826_v25  ;;  %v558_v55 = vadd.f32 %v557_v36, %v321_v49  ;;  %1563 = vmatpush.bf16.msra.mxu0 %v2158_v43  ;;  %v85_v49 = vpack.c.bf16 %v68_v6, %v67_v8  ;;  %v326_v30 = vpop.f32.mrf.mxu1 }
 0x15d   :  { %v638_v45 = vadd.f32 %v2694_v2, %v469_v47 }
 0x15e   :  { %v639_v31 = vadd.f32 %v2699_v7, %v558_v55 }
 0x15f   :  { %v702_v48 = vmax.f32 %v638_v45, 0.0 }
 0x160   :  { %v703_v43 = vmax.f32 %v639_v31, 0.0 }
 0x162   :  { %v470_v14 = vpop.f32.mrf.mxu2 }
 0x163   :  { %v471_v34 = vadd.f32 %v470_v14, %v234_v3  ;;  %v559_v20 = vpop.f32.mrf.mxu3 }
 0x164   :  { %v560_v39 = vadd.f32 %v559_v20, %v323_v10  ;;  %v239_v10 = vpop.f32.mrf.mxu0  ;;  %v328_v14 = vpop.f32.mrf.mxu1  ;;  %v70_v20 = vld [vmem:[%s3384_s0 + $0xf8] sm:$0xff] }
 0x165   :  { %v640_v21 = vadd.f32 %v2694_v2, %v471_v34  ;;  %v69_v34 = vld [vmem:[%s3384_s0 + $0xf0] sm:$0xff] }
 0x166   :  { %v641_v46 = vadd.f32 %v2699_v7, %v560_v39 }
 0x167   :  { %v704_v36 = vmax.f32 %v640_v21, 0.0  ;;  %1908 = vmatmul.msk.bf16.gmra.mxu2 %vm149_vm0, %v85_v49 }
 0x168   :  { %v705_v62 = vmax.f32 %v641_v46, 0.0  ;;  %1924 = vmatmul.msk.bf16.gmra.mxu3 %vm149_vm0, %v85_v49  ;;  %v86_v46 = vpack.c.bf16 %v70_v20, %v69_v34 }
 0x169   :  { %v2848_v3 = vpack.c.bf16 %v704_v36, %v702_v48 }
 0x16a   :  { %v473_v47 = vpop.f32.mrf.mxu2  ;;  %v2850_v8 = vpack.c.bf16 %v705_v62, %v703_v43 }
 0x16b   :  { %v562_v55 = vpop.f32.mrf.mxu3  ;;  %1009 = vmatmul.bf16.gmra.mxu0 %v2848_v3  ;;  %v474_v6 = vadd.f32 %v473_v47, %v237_v44 }
 0x16c   :  { %1098 = vmatmul.bf16.gmra.mxu1 %v2850_v8  ;;  %v563_v45 = vadd.f32 %v562_v55, %v326_v30  ;;  %v242_v55 = vpop.f32.mrf.mxu0 }
 0x16d   :  { %v642_v31 = vadd.f32 %v2694_v2, %v474_v6  ;;  %v331_v6 = vpop.f32.mrf.mxu1 }
 0x16e   :  { %v643_v48 = vadd.f32 %v2699_v7, %v563_v45 }
 0x16f   :  { %v706_v43 = vmax.f32 %v642_v31, 0.0  ;;  %v2157_v31 = vld [vmem:[%s3385_s7 + $0x18] sm:$0xff] }
 0x170   :  { %v707_v47 = vmax.f32 %v643_v48, 0.0  ;;  %1564 = vmatpush.bf16.msra.mxu0 %v2157_v31 }
 0x172   :  { %v475_v49 = vpop.f32.mrf.mxu2 }
 0x173   :  { %v476_v39 = vadd.f32 %v475_v49, %v239_v10  ;;  %v564_v21 = vpop.f32.mrf.mxu3 }
 0x174   :  { %v565_v36 = vadd.f32 %v564_v21, %v328_v14  ;;  %v244_v21 = vpop.f32.mrf.mxu0 }
 0x175   :  { %v644_v44 = vadd.f32 %v2694_v2, %v476_v39  ;;  %v2165_v39 = vld [vmem:[%s3385_s7 + $0x58] sm:$0xff]  ;;  %v333_v48 = vpop.f32.mrf.mxu1 }
 0x176   :  { %v645_v30 = vadd.f32 %v2699_v7, %v565_v36  ;;  %1653 = vmatpush.bf16.msra.mxu1 %v2165_v39 }
 0x177   :  { %v708_v62 = vmax.f32 %v644_v44, 0.0  ;;  %1909 = vmatmul.msk.bf16.gmra.mxu2 %vm149_vm0, %v86_v46 }
 0x178   :  { %v709_v42 = vmax.f32 %v645_v30, 0.0  ;;  %1925 = vmatmul.msk.bf16.gmra.mxu3 %vm149_vm0, %v86_v46 }
 0x179   :  { %v2866_v10 = vpack.c.bf16 %v708_v62, %v706_v43 }
 0x17a   :  { %v478_v34 = vpop.f32.mrf.mxu2  ;;  %v2868_v20 = vpack.c.bf16 %v709_v42, %v707_v47 }
 0x17b   :  { %v567_v14 = vpop.f32.mrf.mxu3  ;;  %1014 = vmatmul.bf16.gmra.mxu0 %v2866_v10  ;;  %v479_v45 = vadd.f32 %v478_v34, %v242_v55 }
 0x17c   :  { %1103 = vmatmul.bf16.gmra.mxu1 %v2868_v20  ;;  %v568_v49 = vadd.f32 %v567_v14, %v331_v6 }
 0x17d   :  { %v646_v42 = vadd.f32 %v2694_v2, %v479_v45 }
 0x17e   :  { %v647_v30 = vadd.f32 %v2699_v7, %v568_v49 }
 0x17f   :  { %v710_v55 = vmax.f32 %v646_v42, 0.0 }
 0x180   :  { %v711_v34 = vmax.f32 %v647_v30, 0.0 }
 0x182   :  { %v480_v46 = vpop.f32.mrf.mxu2 }
 0x183   :  { %v481_v36 = vadd.f32 %v480_v46, %v244_v21  ;;  %v569_v44 = vpop.f32.mrf.mxu3 }
 0x184   :  { %v570_v43 = vadd.f32 %v569_v44, %v333_v48 }
 0x185   :  { %v648_v62 = vadd.f32 %v2694_v2, %v481_v36 }
 0x186   :  { %v649_v47 = vadd.f32 %v2699_v7, %v570_v43 }
 0x187   :  { %v712_v6 = vmax.f32 %v648_v62, 0.0  ;;  %1162 = vmatmul.bf16.vlgmr.msra.gmra.mxu2 %v2716_v24  ;;  %v2895_v24 = vld [vmem:[%s3387_s6] sm:$0x3] }
 0x188   :  { %v713_v14 = vmax.f32 %v649_v47, 0.0  ;;  %1251 = vmatmul.bf16.vlgmr.msra.gmra.mxu3 %v2718_v58 }
 0x189   :  { %v2884_v31 = vpack.c.bf16 %v712_v6, %v710_v55 }
 0x18a   :  { %v483_v45 = vpop.f32.mrf.mxu2  ;;  %v2886_v39 = vpack.c.bf16 %v713_v14, %v711_v34 }
 0x18b   :  { %v572_v21 = vpop.f32.mrf.mxu3  ;;  %1019 = vmatmul.bf16.gmra.mxu0 %v2884_v31  ;;  %v484_v49 = vadd.f32 %v483_v45, %v2385_v63  ;;  %v2903_v63 = vperm.slane %v2895_v24, 0 }
 0x18c   :  { %1108 = vmatmul.bf16.gmra.mxu1 %v2886_v39  ;;  %v573_v46 = vadd.f32 %v572_v21, %v2387_v0 }
 0x18d   :  { %v650_v58 = vadd.f32 %v2694_v2, %v484_v49 }
 0x18e   :  { %v651_v44 = vadd.f32 %v2699_v7, %v573_v46 }
 0x18f   :  { %v714_v62 = vmax.f32 %v650_v58, 0.0  ;;  %v2156_v58 = vld [vmem:[%s3385_s7 + $0x10] sm:$0xff] }
 0x190   :  { %v715_v55 = vmax.f32 %v651_v44, 0.0  ;;  %1565 = vmatpush.bf16.msra.mxu0 %v2156_v58 }
 0x192   :  { %v485_v42 = vpop.f32.mrf.mxu2 }
 0x193   :  { %v486_v48 = vadd.f32 %v485_v42, %v2413_v12  ;;  %v574_v36 = vpop.f32.mrf.mxu3 }
 0x194   :  { %v575_v30 = vadd.f32 %v574_v36, %v2415_v13 }
 0x195   :  { %v652_v43 = vadd.f32 %v2694_v2, %v486_v48  ;;  %v2164_v48 = vld [vmem:[%s3385_s7 + $0x50] sm:$0xff] }
 0x196   :  { %v653_v0 = vadd.f32 %v2699_v7, %v575_v30  ;;  %1654 = vmatpush.bf16.msra.mxu1 %v2164_v48 }
 0x197   :  { %v716_v47 = vmax.f32 %v652_v43, 0.0  ;;  %1167 = vmatmul.bf16.gmra.mxu2 %v2746_v54 }
 0x198   :  { %v717_v6 = vmax.f32 %v653_v0, 0.0  ;;  %1256 = vmatmul.bf16.gmra.mxu3 %v2748_v9  ;;  %v985_v12 = vpop.f32.mrf.mxu0 }
 0x199   :  { %v986_v34 = vadd.f32 %v985_v12, %v2903_v63  ;;  %v1074_v14 = vpop.f32.mrf.mxu1  ;;  %v2909_v13 = vpack.c.bf16 %v716_v47, %v714_v62 }
 0x19a   :  { %v488_v45 = vpop.f32.mrf.mxu2  ;;  %v2911_v21 = vpack.c.bf16 %v717_v6, %v715_v55 }
 0x19b   :  { %v1075_v49 = vadd.f32 %v1074_v14, %v986_v34  ;;  %v577_v46 = vpop.f32.mrf.mxu3  ;;  %1024 = vmatmul.bf16.gmra.mxu0 %v2909_v13  ;;  %v489_v54 = vadd.f32 %v488_v45, %v2427_v18 }
 0x19c   :  { %1113 = vmatmul.bf16.gmra.mxu1 %v2911_v21  ;;  %v578_v42 = vadd.f32 %v577_v46, %v2429_v19 }
 0x19d   :  { %v654_v43 = vadd.f32 %v2694_v2, %v489_v54  ;;  %v1332_v55 = vmax.f32 %v1075_v49, 0.0 }
 0x19e   :  { %v655_v62 = vadd.f32 %v2699_v7, %v578_v42 }
 0x19f   :  { %v718_v14 = vmax.f32 %v654_v43, 0.0 }
 0x1a0   :  { %v987_v9 = vpop.f32.mrf.mxu0  ;;  %v719_v54 = vmax.f32 %v655_v62, 0.0 }
 0x1a1   :  { %v988_v36 = vadd.f32 %v987_v9, %v2903_v63  ;;  %v1076_v44 = vpop.f32.mrf.mxu1 }
 0x1a2   :  { %v490_v30 = vpop.f32.mrf.mxu2 }
 0x1a3   :  { %v1077_v18 = vadd.f32 %v1076_v44, %v988_v36  ;;  %v491_v19 = vadd.f32 %v490_v30, %v2449_v28  ;;  %v579_v0 = vpop.f32.mrf.mxu3 }
 0x1a4   :  { %v580_v47 = vadd.f32 %v579_v0, %v2451_v29 }
 0x1a5   :  { %v1334_v6 = vmax.f32 %v1077_v18, 0.0  ;;  %v656_v12 = vadd.f32 %v2694_v2, %v491_v19 }
 0x1a6   :  { %v657_v34 = vadd.f32 %v2699_v7, %v580_v47 }
 0x1a7   :  { %v2930_v45 = vpack.c.bf16 %v1334_v6, %v1332_v55  ;;  %v720_v46 = vmax.f32 %v656_v12, 0.0  ;;  %1172 = vmatmul.bf16.gmra.mxu2 %v2770_v59 }
 0x1a8   :  { %v721_v9 = vmax.f32 %v657_v34, 0.0  ;;  %1261 = vmatmul.bf16.gmra.mxu3 %v2772_v11  ;;  %v990_v28 = vpop.f32.mrf.mxu0 }
 0x1a9   :  { %v991_v42 = vadd.f32 %v990_v28, %v2903_v63  ;;  %v1079_v29 = vpop.f32.mrf.mxu1  ;;  %v2935_v49 = vpack.c.bf16 %v720_v46, %v718_v14 }
 0x1aa   :  { %v493_v58 = vpop.f32.mrf.mxu2  ;;  %v2937_v48 = vpack.c.bf16 %v721_v9, %v719_v54 }
 0x1ab   :  { %v1080_v36 = vadd.f32 %v1079_v29, %v991_v42  ;;  %v582_v44 = vpop.f32.mrf.mxu3  ;;  %1029 = vmatmul.bf16.gmra.mxu0 %v2935_v49  ;;  %v494_v59 = vadd.f32 %v493_v58, %v2469_v37 }
 0x1ac   :  { %1118 = vmatmul.bf16.gmra.mxu1 %v2937_v48  ;;  %v583_v30 = vadd.f32 %v582_v44, %v2471_v38 }
 0x1ad   :  { %v658_v0 = vadd.f32 %v2694_v2, %v494_v59  ;;  %v1336_v34 = vmax.f32 %v1080_v36, 0.0 }
 0x1ae   :  { %v659_v6 = vadd.f32 %v2699_v7, %v583_v30 }
 0x1af   :  { %v722_v46 = vmax.f32 %v658_v0, 0.0 }
 0x1b0   :  { %v992_v11 = vpop.f32.mrf.mxu0  ;;  %v723_v28 = vmax.f32 %v659_v6, 0.0 }
 0x1b1   :  { %v993_v43 = vadd.f32 %v992_v11, %v2903_v63  ;;  %v1081_v18 = vpop.f32.mrf.mxu1 }
 0x1b2   :  { %v495_v19 = vpop.f32.mrf.mxu2 }
 0x1b3   :  { %v1082_v62 = vadd.f32 %v1081_v18, %v993_v43  ;;  %v496_v47 = vadd.f32 %v495_v19, %v2497_v50  ;;  %v584_v55 = vpop.f32.mrf.mxu3  ;;  %v2155_v43 = vld [vmem:[%s3385_s7 + $0x8] sm:$0xff] }
 0x1b4   :  { %v585_v12 = vadd.f32 %v584_v55, %v2499_v51  ;;  %v2163_v18 = vld [vmem:[%s3385_s7 + $0x48] sm:$0xff]  ;;  %1566 = vmatpush.bf16.msra.mxu0 %v2155_v43 }
 0x1b5   :  { %v1338_v14 = vmax.f32 %v1082_v62, 0.0  ;;  %v660_v37 = vadd.f32 %v2694_v2, %v496_v47  ;;  %1655 = vmatpush.bf16.msra.mxu1 %v2163_v18 }
 0x1b6   :  { %v661_v38 = vadd.f32 %v2699_v7, %v585_v12 }
 0x1b7   :  { %v724_v54 = vmax.f32 %v660_v37, 0.0  ;;  %1177 = vmatmul.bf16.gmra.mxu2 %v2800_v1  ;;  %v2951_v9 = vpack.c.bf16 %v1338_v14, %v1336_v34 }
 0x1b8   :  { %v725_v42 = vmax.f32 %v661_v38, 0.0  ;;  %1266 = vmatmul.bf16.gmra.mxu3 %v2802_v23  ;;  %v995_v50 = vpop.f32.mrf.mxu0 }
 0x1b9   :  { %v996_v29 = vadd.f32 %v995_v50, %v2903_v63  ;;  %v1084_v51 = vpop.f32.mrf.mxu1  ;;  %v2955_v58 = vpack.c.bf16 %v724_v54, %v722_v46 }
 0x1ba   :  { %v498_v36 = vpop.f32.mrf.mxu2  ;;  %v2957_v44 = vpack.c.bf16 %v725_v42, %v723_v28 }
 0x1bb   :  { %v1085_v59 = vadd.f32 %v1084_v51, %v996_v29  ;;  %v587_v30 = vpop.f32.mrf.mxu3  ;;  %1034 = vmatmul.bf16.gmra.mxu0 %v2955_v58  ;;  %v499_v1 = vadd.f32 %v498_v36, %v2511_v56 }
 0x1bc   :  { %1123 = vmatmul.bf16.gmra.mxu1 %v2957_v44  ;;  %v588_v11 = vadd.f32 %v587_v30, %v2513_v57 }
 0x1bd   :  { %v662_v47 = vadd.f32 %v2694_v2, %v499_v1  ;;  %v1340_v34 = vmax.f32 %v1085_v59, 0.0 }
 0x1be   :  { %v663_v6 = vadd.f32 %v2699_v7, %v588_v11 }
 0x1bf   :  { %v726_v46 = vmax.f32 %v662_v47, 0.0 }
 0x1c0   :  { %v997_v23 = vpop.f32.mrf.mxu0  ;;  %v727_v42 = vmax.f32 %v663_v6, 0.0 }
 0x1c1   :  { %v998_v19 = vadd.f32 %v997_v23, %v2903_v63  ;;  %v1086_v0 = vpop.f32.mrf.mxu1 }
 0x1c2   :  { %v500_v62 = vpop.f32.mrf.mxu2 }
 0x1c3   :  { %v1087_v56 = vadd.f32 %v1086_v0, %v998_v19  ;;  %v501_v57 = vadd.f32 %v500_v62, %v2533_v4  ;;  %v589_v55 = vpop.f32.mrf.mxu3 }
 0x1c4   :  { %v590_v12 = vadd.f32 %v589_v55, %v2535_v5 }
 0x1c5   :  { %v1342_v14 = vmax.f32 %v1087_v56, 0.0  ;;  %v664_v37 = vadd.f32 %v2694_v2, %v501_v57 }
 0x1c6   :  { %v665_v38 = vadd.f32 %v2699_v7, %v590_v12 }
 0x1c7   :  { %v728_v54 = vmax.f32 %v664_v37, 0.0  ;;  %1182 = vmatmul.bf16.gmra.mxu2 %v2824_v35  ;;  %v2977_v28 = vpack.c.bf16 %v1342_v14, %v1340_v34 }
 0x1c8   :  { %v729_v50 = vmax.f32 %v665_v38, 0.0  ;;  %1271 = vmatmul.bf16.gmra.mxu3 %v2826_v25  ;;  %v1000_v4 = vpop.f32.mrf.mxu0 }
 0x1c9   :  { %v1001_v29 = vadd.f32 %v1000_v4, %v2903_v63  ;;  %v1089_v5 = vpop.f32.mrf.mxu1  ;;  %v2981_v51 = vpack.c.bf16 %v728_v54, %v726_v46 }
 0x1ca   :  { %v503_v36 = vpop.f32.mrf.mxu2  ;;  %v2983_v59 = vpack.c.bf16 %v729_v50, %v727_v42 }
 0x1cb   :  { %v1090_v30 = vadd.f32 %v1089_v5, %v1001_v29  ;;  %v592_v1 = vpop.f32.mrf.mxu3  ;;  %1039 = vmatmul.bf16.gmra.mxu0 %v2981_v51  ;;  %v504_v35 = vadd.f32 %v503_v36, %v2553_v15  ;;  %v2154_v36 = vld [vmem:[%s3385_s7] sm:$0xff] }
 0x1cc   :  { %1128 = vmatmul.bf16.gmra.mxu1 %v2983_v59  ;;  %v593_v11 = vadd.f32 %v592_v1, %v2555_v16  ;;  %1567 = vmatpush.bf16.msra.mxu0 %v2154_v36 }
 0x1cd   :  { %v666_v19 = vadd.f32 %v2694_v2, %v504_v35  ;;  %v1344_v55 = vmax.f32 %v1090_v30, 0.0  ;;  %v2162_v30 = vld [vmem:[%s3385_s7 + $0x40] sm:$0xff] }
 0x1ce   :  { %v667_v56 = vadd.f32 %v2699_v7, %v593_v11  ;;  %1656 = vmatpush.bf16.msra.mxu1 %v2162_v30 }
 0x1cf   :  { %v730_v12 = vmax.f32 %v666_v19, 0.0 }
 0x1d0   :  { %v1002_v25 = vpop.f32.mrf.mxu0  ;;  %v731_v37 = vmax.f32 %v667_v56, 0.0 }
 0x1d1   :  { %v1003_v23 = vadd.f32 %v1002_v25, %v2903_v63  ;;  %v1091_v43 = vpop.f32.mrf.mxu1 }
 0x1d2   :  { %v505_v18 = vpop.f32.mrf.mxu2 }
 0x1d3   :  { %v1092_v0 = vadd.f32 %v1091_v43, %v1003_v23  ;;  %v506_v62 = vadd.f32 %v505_v18, %v2581_v32  ;;  %v594_v47 = vpop.f32.mrf.mxu3 }
 0x1d4   :  { %v595_v57 = vadd.f32 %v594_v47, %v2583_v33 }
 0x1d5   :  { %v1346_v6 = vmax.f32 %v1092_v0, 0.0  ;;  %v668_v15 = vadd.f32 %v2694_v2, %v506_v62 }
 0x1d6   :  { %v669_v16 = vadd.f32 %v2699_v7, %v595_v57 }
 0x1d7   :  { %v732_v34 = vmax.f32 %v668_v15, 0.0  ;;  %1187 = vmatmul.bf16.gmra.mxu2 %v2848_v3  ;;  %v2997_v14 = vpack.c.bf16 %v1346_v6, %v1344_v55 }
 0x1d8   :  { %v733_v38 = vmax.f32 %v669_v16, 0.0  ;;  %1276 = vmatmul.bf16.gmra.mxu3 %v2850_v8  ;;  %v1005_v32 = vpop.f32.mrf.mxu0 }
 0x1d9   :  { %v1006_v46 = vadd.f32 %v1005_v32, %v2903_v63  ;;  %v1094_v33 = vpop.f32.mrf.mxu1  ;;  %v3001_v54 = vpack.c.bf16 %v732_v34, %v730_v12 }
 0x1da   :  { %v508_v42 = vpop.f32.mrf.mxu2  ;;  %v3003_v50 = vpack.c.bf16 %v733_v38, %v731_v37 }
 0x1db   :  { %v1095_v4 = vadd.f32 %v1094_v33, %v1006_v46  ;;  %v597_v29 = vpop.f32.mrf.mxu3  ;;  %1044 = vmatmul.bf16.gmra.mxu0 %v3001_v54  ;;  %v509_v3 = vadd.f32 %v508_v42, %v2595_v40 }
 0x1dc   :  { %1133 = vmatmul.bf16.gmra.mxu1 %v3003_v50  ;;  %v598_v5 = vadd.f32 %v597_v29, %v2597_v41 }
 0x1dd   :  { %v670_v25 = vadd.f32 %v2694_v2, %v509_v3  ;;  %v1348_v19 = vmax.f32 %v1095_v4, 0.0 }
 0x1de   :  { %v671_v43 = vadd.f32 %v2699_v7, %v598_v5 }
 0x1df   :  { %v734_v56 = vmax.f32 %v670_v25, 0.0 }
 0x1e0   :  { %v1007_v8 = vpop.f32.mrf.mxu0  ;;  %v735_v6 = vmax.f32 %v671_v43, 0.0 }
 0x1e1   :  { %v1008_v1 = vadd.f32 %v1007_v8, %v2903_v63  ;;  %v1096_v35 = vpop.f32.mrf.mxu1 }
 0x1e2   :  { %v510_v11 = vpop.f32.mrf.mxu2 }
 0x1e3   :  { %v1097_v40 = vadd.f32 %v1096_v35, %v1008_v1  ;;  %v511_v41 = vadd.f32 %v510_v11, %v2617_v52  ;;  %v599_v23 = vpop.f32.mrf.mxu3 }
 0x1e4   :  { %v600_v18 = vadd.f32 %v599_v23, %v2619_v53 }
 0x1e5   :  { %v1350_v0 = vmax.f32 %v1097_v40, 0.0  ;;  %v672_v62 = vadd.f32 %v2694_v2, %v511_v41 }
 0x1e6   :  { %v673_v47 = vadd.f32 %v2699_v7, %v600_v18 }
 0x1e7   :  { %v736_v57 = vmax.f32 %v672_v62, 0.0  ;;  %1192 = vmatmul.bf16.gmra.mxu2 %v2866_v10  ;;  %v3023_v55 = vpack.c.bf16 %v1350_v0, %v1348_v19 }
 0x1e8   :  { %v737_v15 = vmax.f32 %v673_v47, 0.0  ;;  %1281 = vmatmul.bf16.gmra.mxu3 %v2868_v20  ;;  %v1010_v52 = vpop.f32.mrf.mxu0 }
 0x1e9   :  { %v1011_v16 = vadd.f32 %v1010_v52, %v2903_v63  ;;  %v1099_v53 = vpop.f32.mrf.mxu1  ;;  %v3027_v12 = vpack.c.bf16 %v736_v57, %v734_v56 }
 0x1ea   :  { %v513_v34 = vpop.f32.mrf.mxu2  ;;  %v3029_v37 = vpack.c.bf16 %v737_v15, %v735_v6 }
 0x1eb   :  { %v1100_v38 = vadd.f32 %v1099_v53, %v1011_v16  ;;  %v602_v32 = vpop.f32.mrf.mxu3  ;;  %1049 = vmatmul.bf16.gmra.mxu0 %v3027_v12  ;;  %v514_v10 = vadd.f32 %v513_v34, %v2629_v60  ;;  %v3394_v53 = vld [vmem:[#allocation2_spill] sm:$0xff] }
 0x1ec   :  { %1138 = vmatmul.bf16.gmra.mxu1 %v3029_v37  ;;  %v603_v46 = vadd.f32 %v602_v32, %v2631_v61 }
 0x1ed   :  { %v674_v29 = vadd.f32 %v2694_v2, %v514_v10  ;;  %v1352_v1 = vmax.f32 %v1100_v38, 0.0  ;;  %v3395_v10 = vld [vmem:[#allocation3_spill] sm:$0xff] }
 0x1ee   :  { %v675_v36 = vadd.f32 %v2699_v7, %v603_v46 }
 0x1ef   :  { %v738_v11 = vmax.f32 %v674_v29, 0.0 }
 0x1f0   :  { %v1012_v20 = vpop.f32.mrf.mxu0  ;;  %v739_v41 = vmax.f32 %v675_v36, 0.0 }
 0x1f1   :  { %v1013_v33 = vadd.f32 %v1012_v20, %v2903_v63  ;;  %v1101_v42 = vpop.f32.mrf.mxu1 }
 0x1f2   :  { %v515_v4 = vpop.f32.mrf.mxu2 }
 0x1f3   :  { %v1102_v3 = vadd.f32 %v1101_v42, %v1013_v33  ;;  %v516_v5 = vadd.f32 %v515_v4, %v2657_v17  ;;  %v604_v8 = vpop.f32.mrf.mxu3 }
 0x1f4   :  { %v605_v30 = vadd.f32 %v604_v8, %v2659_v22 }
 0x1f5   :  { %v1354_v35 = vmax.f32 %v1102_v3, 0.0  ;;  %v676_v60 = vadd.f32 %v2694_v2, %v516_v5 }
 0x1f6   :  { %v677_v61 = vadd.f32 %v2699_v7, %v605_v30 }
 0x1f7   :  { %v740_v25 = vmax.f32 %v676_v60, 0.0  ;;  %1197 = vmatmul.bf16.gmra.mxu2 %v2884_v31  ;;  %v3043_v40 = vpack.c.bf16 %v1354_v35, %v1352_v1  ;;  %v3072_v60 = vperm.slane %v2895_v24, 1 }
 0x1f8   :  { %v741_v23 = vmax.f32 %v677_v61, 0.0  ;;  %1286 = vmatmul.bf16.gmra.mxu3 %v2886_v39  ;;  %v1015_v17 = vpop.f32.mrf.mxu0 }
 0x1f9   :  { %v1016_v43 = vadd.f32 %v1015_v17, %v2903_v63  ;;  %v1104_v22 = vpop.f32.mrf.mxu1  ;;  %v3047_v18 = vpack.c.bf16 %v740_v25, %v738_v11 }
 0x1fa   :  { %v518_v19 = vpop.f32.mrf.mxu2  ;;  %v3049_v0 = vpack.c.bf16 %v741_v23, %v739_v41 }
 0x1fb   :  { %v1105_v62 = vadd.f32 %v1104_v22, %v1016_v43  ;;  %v607_v47 = vpop.f32.mrf.mxu3  ;;  %1054 = vmatmul.bf16.gmra.mxu0 %v3047_v18  ;;  %v519_v31 = vadd.f32 %v518_v19, %v2663_v26 }
 0x1fc   :  { %1143 = vmatmul.bf16.gmra.mxu1 %v3049_v0  ;;  %v608_v56 = vadd.f32 %v607_v47, %v2665_v27 }
 0x1fd   :  { %v678_v52 = vadd.f32 %v2694_v2, %v519_v31  ;;  %v1356_v20 = vmax.f32 %v1105_v62, 0.0 }
 0x1fe   :  { %v679_v32 = vadd.f32 %v2699_v7, %v608_v56 }
 0x1ff   :  { %v742_v42 = vmax.f32 %v678_v52, 0.0 }
 0x200   :  { %v1017_v39 = vpop.f32.mrf.mxu0  ;;  %v743_v3 = vmax.f32 %v679_v32, 0.0 }
 0x201   :  { %v1018_v57 = vadd.f32 %v1017_v39, %v2903_v63  ;;  %v1106_v6 = vpop.f32.mrf.mxu1 }
 0x202   :  { %v520_v15 = vpop.f32.mrf.mxu2 }
 0x203   :  { %v1107_v16 = vadd.f32 %v1106_v6, %v1018_v57  ;;  %v521_v34 = vadd.f32 %v520_v15, %v3394_v53  ;;  %v609_v38 = vpop.f32.mrf.mxu3 }
 0x204   :  { %v610_v46 = vadd.f32 %v609_v38, %v3395_v10 }
 0x205   :  { %v1358_v33 = vmax.f32 %v1107_v16, 0.0  ;;  %v680_v26 = vadd.f32 %v2694_v2, %v521_v34 }
 0x206   :  { %v681_v27 = vadd.f32 %v2699_v7, %v610_v46 }
 0x207   :  { %v744_v4 = vmax.f32 %v680_v26, 0.0  ;;  %1202 = vmatmul.bf16.gmra.mxu2 %v2909_v13  ;;  %v3063_v29 = vpack.c.bf16 %v1358_v33, %v1356_v20 }
 0x208   :  { %v745_v5 = vmax.f32 %v681_v27, 0.0  ;;  %1291 = vmatmul.bf16.gmra.mxu3 %v2911_v21  ;;  %v1020_v8 = vpop.f32.mrf.mxu0 }
 0x209   :  { %v1021_v36 = vadd.f32 %v1020_v8, %v2903_v63  ;;  %v1109_v30 = vpop.f32.mrf.mxu1  ;;  %v3067_v1 = vpack.c.bf16 %v744_v4, %v742_v42 }
 0x20a   :  { %v1163_v35 = vpop.f32.mrf.mxu2  ;;  %v3069_v2 = vpack.c.bf16 %v745_v5, %v743_v3 }
 0x20b   :  { %v1110_v7 = vadd.f32 %v1109_v30, %v1021_v36  ;;  %v1252_v13 = vpop.f32.mrf.mxu3  ;;  %1059 = vmatmul.bf16.gmra.mxu0 %v3067_v1  ;;  %v1164_v21 = vadd.f32 %v1163_v35, %v3072_v60 }
 0x20c   :  { %1148 = vmatmul.bf16.gmra.mxu1 %v3069_v2 }
 0x20d   :  { %v1253_v23 = vadd.f32 %v1252_v13, %v1164_v21  ;;  %v1360_v19 = vmax.f32 %v1110_v7, 0.0 }
 0x20f   :  { %v1333_v47 = vmax.f32 %v1253_v23, 0.0 }
 0x210   :  { %v1022_v61 = vpop.f32.mrf.mxu0 }
 0x211   :  { %v1023_v11 = vadd.f32 %v1022_v61, %v2903_v63  ;;  %v1111_v25 = vpop.f32.mrf.mxu1 }
 0x212   :  { %v1165_v41 = vpop.f32.mrf.mxu2 }
 0x213   :  { %v1112_v17 = vadd.f32 %v1111_v25, %v1023_v11  ;;  %v1166_v43 = vadd.f32 %v1165_v41, %v3072_v60  ;;  %v1254_v22 = vpop.f32.mrf.mxu3 }
 0x215   :  { %v1362_v24 = vmax.f32 %v1112_v17, 0.0  ;;  %v1255_v62 = vadd.f32 %v1254_v22, %v1166_v43 }
 0x217   :  { %v1335_v31 = vmax.f32 %v1255_v62, 0.0  ;;  %1207 = vmatmul.bf16.gmra.mxu2 %v2935_v49  ;;  %v3080_v56 = vpack.c.bf16 %v1362_v24, %v1360_v19 }
 0x218   :  { %1296 = vmatmul.bf16.gmra.mxu3 %v2937_v48  ;;  %v1025_v39 = vpop.f32.mrf.mxu0 }
 0x219   :  { %v1397_v57 = vpack.c.bf16 %v1335_v31, %v1333_v47  ;;  %v1026_v6 = vadd.f32 %v1025_v39, %v2903_v63  ;;  %v1114_v15 = vpop.f32.mrf.mxu1 }
 0x21a   :  { %v1168_v52 = vpop.f32.mrf.mxu2 }
 0x21b   :  { %v1115_v16 = vadd.f32 %v1114_v15, %v1026_v6  ;;  %v1257_v53 = vpop.f32.mrf.mxu3  ;;  %1568 = vmatmul.bf16.vlgmr.msra.gmra.mxu0 %v2930_v45  ;;  %v1169_v34 = vadd.f32 %v1168_v52, %v3072_v60 }
 0x21c   :  { %1657 = vmatmul.bf16.vlgmr.msra.gmra.mxu1 %v1397_v57 }
 0x21d   :  { %v1258_v46 = vadd.f32 %v1257_v53, %v1169_v34  ;;  %v1364_v26 = vmax.f32 %v1115_v16, 0.0 }
 0x21f   :  { %v1337_v4 = vmax.f32 %v1258_v46, 0.0 }
 0x220   :  { %v1027_v38 = vpop.f32.mrf.mxu0 }
 0x221   :  { %v1028_v49 = vadd.f32 %v1027_v38, %v2903_v63  ;;  %v1116_v32 = vpop.f32.mrf.mxu1 }
 0x222   :  { %v1170_v10 = vpop.f32.mrf.mxu2 }
 0x223   :  { %v1117_v48 = vadd.f32 %v1116_v32, %v1028_v49  ;;  %v1171_v20 = vadd.f32 %v1170_v10, %v3072_v60  ;;  %v1259_v33 = vpop.f32.mrf.mxu3 }
 0x225   :  { %v1366_v27 = vmax.f32 %v1117_v48, 0.0  ;;  %v1260_v42 = vadd.f32 %v1259_v33, %v1171_v20 }
 0x227   :  { %v1339_v3 = vmax.f32 %v1260_v42, 0.0  ;;  %1212 = vmatmul.bf16.gmra.mxu2 %v2955_v58  ;;  %v3089_v45 = vpack.c.bf16 %v1366_v27, %v1364_v26 }
 0x228   :  { %1301 = vmatmul.bf16.gmra.mxu3 %v2957_v44  ;;  %v1030_v5 = vpop.f32.mrf.mxu0 }
 0x229   :  { %v1031_v8 = vadd.f32 %v1030_v5, %v2903_v63  ;;  %v1119_v36 = vpop.f32.mrf.mxu1  ;;  %v1399_v30 = vpack.c.bf16 %v1339_v3, %v1337_v4 }
 0x22a   :  { %v1173_v35 = vpop.f32.mrf.mxu2 }
 0x22b   :  { %v1120_v7 = vadd.f32 %v1119_v36, %v1031_v8  ;;  %v1262_v13 = vpop.f32.mrf.mxu3  ;;  %1573 = vmatmul.bf16.gmra.mxu0 %v2951_v9  ;;  %v1174_v21 = vadd.f32 %v1173_v35, %v3072_v60 }
 0x22c   :  { %1662 = vmatmul.bf16.gmra.mxu1 %v1399_v30 }
 0x22d   :  { %v1263_v41 = vadd.f32 %v1262_v13, %v1174_v21  ;;  %v1368_v43 = vmax.f32 %v1120_v7, 0.0 }
 0x22f   :  { %v1341_v24 = vmax.f32 %v1263_v41, 0.0 }
 0x230   :  { %v1032_v61 = vpop.f32.mrf.mxu0 }
 0x231   :  { %v1033_v58 = vadd.f32 %v1032_v61, %v2903_v63  ;;  %v1121_v11 = vpop.f32.mrf.mxu1 }
 0x232   :  { %v1175_v25 = vpop.f32.mrf.mxu2 }
 0x233   :  { %v1122_v44 = vadd.f32 %v1121_v11, %v1033_v58  ;;  %v1176_v23 = vadd.f32 %v1175_v25, %v3072_v60  ;;  %v1264_v17 = vpop.f32.mrf.mxu3 }
 0x235   :  { %v1370_v22 = vmax.f32 %v1122_v44, 0.0  ;;  %v1265_v19 = vadd.f32 %v1264_v17, %v1176_v23 }
 0x237   :  { %v1343_v62 = vmax.f32 %v1265_v19, 0.0  ;;  %1217 = vmatmul.bf16.gmra.mxu2 %v2981_v51  ;;  %v3098_v9 = vpack.c.bf16 %v1370_v22, %v1368_v43 }
 0x238   :  { %1306 = vmatmul.bf16.gmra.mxu3 %v2983_v59  ;;  %v1035_v47 = vpop.f32.mrf.mxu0 }
 0x239   :  { %v1036_v31 = vadd.f32 %v1035_v47, %v2903_v63  ;;  %v1124_v39 = vpop.f32.mrf.mxu1  ;;  %v1401_v57 = vpack.c.bf16 %v1343_v62, %v1341_v24 }
 0x23a   :  { %v1178_v6 = vpop.f32.mrf.mxu2 }
 0x23b   :  { %v1125_v15 = vadd.f32 %v1124_v39, %v1036_v31  ;;  %v1267_v52 = vpop.f32.mrf.mxu3  ;;  %1578 = vmatmul.bf16.gmra.mxu0 %v2977_v28  ;;  %v1179_v16 = vadd.f32 %v1178_v6, %v3072_v60 }
 0x23c   :  { %1667 = vmatmul.bf16.gmra.mxu1 %v1401_v57 }
 0x23d   :  { %v1268_v49 = vadd.f32 %v1267_v52, %v1179_v16  ;;  %v1372_v46 = vmax.f32 %v1125_v15, 0.0 }
 0x23f   :  { %v1345_v33 = vmax.f32 %v1268_v49, 0.0 }
 0x240   :  { %v1037_v53 = vpop.f32.mrf.mxu0 }
 0x241   :  { %v1038_v51 = vadd.f32 %v1037_v53, %v2903_v63  ;;  %v1126_v34 = vpop.f32.mrf.mxu1 }
 0x242   :  { %v1180_v38 = vpop.f32.mrf.mxu2 }
 0x243   :  { %v1127_v59 = vadd.f32 %v1126_v34, %v1038_v51  ;;  %v1181_v32 = vadd.f32 %v1180_v38, %v3072_v60  ;;  %v1269_v10 = vpop.f32.mrf.mxu3 }
 0x245   :  { %v1374_v48 = vmax.f32 %v1127_v59, 0.0  ;;  %v1270_v20 = vadd.f32 %v1269_v10, %v1181_v32 }
 0x247   :  { %v1347_v26 = vmax.f32 %v1270_v20, 0.0  ;;  %1222 = vmatmul.bf16.gmra.mxu2 %v3001_v54  ;;  %v3107_v28 = vpack.c.bf16 %v1374_v48, %v1372_v46 }
 0x248   :  { %1311 = vmatmul.bf16.gmra.mxu3 %v3003_v50  ;;  %v1040_v27 = vpop.f32.mrf.mxu0 }
 0x249   :  { %v1041_v42 = vadd.f32 %v1040_v27, %v2903_v63  ;;  %v1129_v4 = vpop.f32.mrf.mxu1  ;;  %v1403_v3 = vpack.c.bf16 %v1347_v26, %v1345_v33 }
 0x24a   :  { %v1183_v5 = vpop.f32.mrf.mxu2 }
 0x24b   :  { %v1130_v8 = vadd.f32 %v1129_v4, %v1041_v42  ;;  %v1272_v36 = vpop.f32.mrf.mxu3  ;;  %1583 = vmatmul.bf16.gmra.mxu0 %v2997_v14  ;;  %v1184_v30 = vadd.f32 %v1183_v5, %v3072_v60 }
 0x24c   :  { %1672 = vmatmul.bf16.gmra.mxu1 %v1403_v3 }
 0x24d   :  { %v1273_v21 = vadd.f32 %v1272_v36, %v1184_v30  ;;  %v1376_v11 = vmax.f32 %v1130_v8, 0.0 }
 0x24f   :  { %v1349_v44 = vmax.f32 %v1273_v21, 0.0 }
 0x250   :  { %v1042_v35 = vpop.f32.mrf.mxu0 }
 0x251   :  { %v1043_v54 = vadd.f32 %v1042_v35, %v2903_v63  ;;  %v1131_v7 = vpop.f32.mrf.mxu1 }
 0x252   :  { %v1185_v13 = vpop.f32.mrf.mxu2 }
 0x253   :  { %v1132_v50 = vadd.f32 %v1131_v7, %v1043_v54  ;;  %v1186_v61 = vadd.f32 %v1185_v13, %v3072_v60  ;;  %v1274_v58 = vpop.f32.mrf.mxu3 }
 0x255   :  { %v1378_v25 = vmax.f32 %v1132_v50, 0.0  ;;  %v1275_v41 = vadd.f32 %v1274_v58, %v1186_v61 }
 0x257   :  { %v1351_v23 = vmax.f32 %v1275_v41, 0.0  ;;  %1227 = vmatmul.bf16.gmra.mxu2 %v3027_v12  ;;  %v3116_v14 = vpack.c.bf16 %v1378_v25, %v1376_v11 }
 0x258   :  { %1316 = vmatmul.bf16.gmra.mxu3 %v3029_v37  ;;  %v1045_v17 = vpop.f32.mrf.mxu0 }
 0x259   :  { %v1405_v43 = vpack.c.bf16 %v1351_v23, %v1349_v44  ;;  %v1046_v22 = vadd.f32 %v1045_v17, %v2903_v63  ;;  %v1134_v19 = vpop.f32.mrf.mxu1 }
 0x25a   :  { %v1188_v24 = vpop.f32.mrf.mxu2 }
 0x25b   :  { %v1135_v62 = vadd.f32 %v1134_v19, %v1046_v22  ;;  %v1277_v47 = vpop.f32.mrf.mxu3  ;;  %1588 = vmatmul.bf16.gmra.mxu0 %v3023_v55  ;;  %v1189_v31 = vadd.f32 %v1188_v24, %v3072_v60 }
 0x25c   :  { %1677 = vmatmul.bf16.gmra.mxu1 %v1405_v43 }
 0x25d   :  { %v1278_v15 = vadd.f32 %v1277_v47, %v1189_v31  ;;  %v1380_v53 = vmax.f32 %v1135_v62, 0.0 }
 0x25f   :  { %v1353_v38 = vmax.f32 %v1278_v15, 0.0 }
 0x260   :  { %v1047_v39 = vpop.f32.mrf.mxu0 }
 0x261   :  { %v1048_v12 = vadd.f32 %v1047_v39, %v2903_v63  ;;  %v1136_v57 = vpop.f32.mrf.mxu1 }
 0x262   :  { %v1190_v6 = vpop.f32.mrf.mxu2 }
 0x263   :  { %v1137_v37 = vadd.f32 %v1136_v57, %v1048_v12  ;;  %v1191_v52 = vadd.f32 %v1190_v6, %v3072_v60  ;;  %v1279_v16 = vpop.f32.mrf.mxu3 }
 0x265   :  { %v1382_v51 = vmax.f32 %v1137_v37, 0.0  ;;  %v1280_v34 = vadd.f32 %v1279_v16, %v1191_v52 }
 0x267   :  { %v1355_v49 = vmax.f32 %v1280_v34, 0.0  ;;  %1232 = vmatmul.bf16.gmra.mxu2 %v3047_v18  ;;  %v3125_v55 = vpack.c.bf16 %v1382_v51, %v1380_v53 }
 0x268   :  { %1321 = vmatmul.bf16.gmra.mxu3 %v3049_v0  ;;  %v1050_v59 = vpop.f32.mrf.mxu0 }
 0x269   :  { %v1407_v32 = vpack.c.bf16 %v1355_v49, %v1353_v38  ;;  %v1051_v10 = vadd.f32 %v1050_v59, %v2903_v63  ;;  %v1139_v46 = vpop.f32.mrf.mxu1 }
 0x26a   :  { %v1193_v48 = vpop.f32.mrf.mxu2 }
 0x26b   :  { %v1140_v20 = vadd.f32 %v1139_v46, %v1051_v10  ;;  %v1282_v33 = vpop.f32.mrf.mxu3  ;;  %1593 = vmatmul.bf16.gmra.mxu0 %v3043_v40  ;;  %v1194_v26 = vadd.f32 %v1193_v48, %v3072_v60 }
 0x26c   :  { %1682 = vmatmul.bf16.gmra.mxu1 %v1407_v32 }
 0x26d   :  { %v1283_v3 = vadd.f32 %v1282_v33, %v1194_v26  ;;  %v1384_v36 = vmax.f32 %v1140_v20, 0.0 }
 0x26f   :  { %v1357_v54 = vmax.f32 %v1283_v3, 0.0 }
 0x270   :  { %v1052_v27 = vpop.f32.mrf.mxu0 }
 0x271   :  { %v1053_v18 = vadd.f32 %v1052_v27, %v2903_v63  ;;  %v1141_v42 = vpop.f32.mrf.mxu1 }
 0x272   :  { %v1195_v4 = vpop.f32.mrf.mxu2 }
 0x273   :  { %v1142_v0 = vadd.f32 %v1141_v42, %v1053_v18  ;;  %v1196_v5 = vadd.f32 %v1195_v4, %v3072_v60  ;;  %v1284_v8 = vpop.f32.mrf.mxu3 }
 0x275   :  { %v1386_v30 = vmax.f32 %v1142_v0, 0.0  ;;  %v1285_v35 = vadd.f32 %v1284_v8, %v1196_v5  ;;  %v3160_v0 = vld [vmem:[%s3389_s9] ss:$0 sm:$0xff] }
 0x277   :  { %v1359_v7 = vmax.f32 %v1285_v35, 0.0  ;;  %1237 = vmatmul.bf16.gmra.mxu2 %v3067_v1  ;;  %v3134_v40 = vpack.c.bf16 %v1386_v30, %v1384_v36  ;;  %v3165_v36 = vld [vmem:[%s3390_s10] ss:$0 sm:$0xff] }
 0x278   :  { %1326 = vmatmul.bf16.gmra.mxu3 %v3069_v2  ;;  %v1055_v13 = vpop.f32.mrf.mxu0 }
 0x279   :  { %v1409_v21 = vpack.c.bf16 %v1359_v7, %v1357_v54  ;;  %v1056_v50 = vadd.f32 %v1055_v13, %v2903_v63  ;;  %v1144_v61 = vpop.f32.mrf.mxu1 }
 0x27a   :  { %v1198_v58 = vpop.f32.mrf.mxu2 }
 0x27b   :  { %v1145_v11 = vadd.f32 %v1144_v61, %v1056_v50  ;;  %v1287_v25 = vpop.f32.mrf.mxu3  ;;  %1598 = vmatmul.bf16.gmra.mxu0 %v3063_v29  ;;  %v1199_v41 = vadd.f32 %v1198_v58, %v3072_v60 }
 0x27c   :  { %1687 = vmatmul.bf16.gmra.mxu1 %v1409_v21 }
 0x27d   :  { %v1288_v43 = vadd.f32 %v1287_v25, %v1199_v41  ;;  %v1388_v24 = vmax.f32 %v1145_v11, 0.0 }
 0x27f   :  { %v1361_v31 = vmax.f32 %v1288_v43, 0.0 }
 0x280   :  { %v1057_v44 = vpop.f32.mrf.mxu0 }
 0x281   :  { %v1058_v1 = vadd.f32 %v1057_v44, %v2903_v63  ;;  %v1146_v23 = vpop.f32.mrf.mxu1 }
 0x282   :  { %v1200_v17 = vpop.f32.mrf.mxu2 }
 0x283   :  { %v1147_v2 = vadd.f32 %v1146_v23, %v1058_v1  ;;  %v1201_v22 = vadd.f32 %v1200_v17, %v3072_v60  ;;  %v1289_v19 = vpop.f32.mrf.mxu3 }
 0x285   :  { %v1390_v62 = vmax.f32 %v1147_v2, 0.0  ;;  %v1290_v47 = vadd.f32 %v1289_v19, %v1201_v22 }
 0x287   :  { %v1363_v39 = vmax.f32 %v1290_v47, 0.0  ;;  %v3142_v12 = vpack.c.bf16 %v1390_v62, %v1388_v24 }
 0x288   :  { %v1060_v29 = vpop.f32.mrf.mxu0 }
 0x289   :  { %v1411_v57 = vpack.c.bf16 %v1363_v39, %v1361_v31  ;;  %v1061_v6 = vadd.f32 %v1060_v29, %v2903_v63  ;;  %v1149_v15 = vpop.f32.mrf.mxu1 }
 0x28a   :  { %v1203_v37 = vpop.f32.mrf.mxu2 }
 0x28b   :  { %v1150_v52 = vadd.f32 %v1149_v15, %v1061_v6  ;;  %v1292_v16 = vpop.f32.mrf.mxu3  ;;  %1603 = vmatmul.bf16.gmra.mxu0 %v3080_v56  ;;  %v1204_v53 = vadd.f32 %v1203_v37, %v3072_v60  ;;  %v3152_v56 = vld [vmem:[%s3388_s8] ss:$0 sm:$0xff] }
 0x28c   :  { %1692 = vmatmul.bf16.gmra.mxu1 %v1411_v57 }
 0x28d   :  { %v1293_v59 = vadd.f32 %v1292_v16, %v1204_v53  ;;  %v1392_v48 = vmax.f32 %v1150_v52, 0.0 }
 0x28f   :  { %v1365_v26 = vmax.f32 %v1293_v59, 0.0 }
 0x290   :  { %v1062_v51 = vpop.f32.mrf.mxu0 }
 0x291   :  { %v1063_v34 = vadd.f32 %v1062_v51, %v2903_v63  ;;  %v1151_v38 = vpop.f32.mrf.mxu1 }
 0x292   :  { %v1205_v49 = vpop.f32.mrf.mxu2 }
 0x293   :  { %v1152_v32 = vadd.f32 %v1151_v38, %v1063_v34  ;;  %v1206_v10 = vadd.f32 %v1205_v49, %v3072_v60  ;;  %v1294_v46 = vpop.f32.mrf.mxu3 }
 0x295   :  { %v1394_v20 = vmax.f32 %v1152_v32, 0.0  ;;  %v1295_v33 = vadd.f32 %v1294_v46, %v1206_v10 }
 0x297   :  { %v1367_v27 = vmax.f32 %v1295_v33, 0.0  ;;  %v3154_v18 = vpack.c.bf16 %v1394_v20, %v1392_v48 }
 0x298   :  { %v1569_v63 = vpop.f32.mrf.mxu0 }
 0x299   :  { %v1413_v42 = vpack.c.bf16 %v1367_v27, %v1365_v26  ;;  %v1570_v4 = vadd.f32 %v3152_v56, %v1569_v63  ;;  %v1658_v3 = vpop.f32.mrf.mxu1 }
 0x29a   :  { %v1208_v5 = vpop.f32.mrf.mxu2 }
 0x29b   :  { %v1659_v8 = vadd.f32 %v1658_v3, %v1570_v4  ;;  %v1297_v30 = vpop.f32.mrf.mxu3  ;;  %1608 = vmatmul.bf16.gmra.mxu0 %v3089_v45  ;;  %v1209_v7 = vadd.f32 %v1208_v5, %v3072_v60 }
 0x29c   :  { %1697 = vmatmul.bf16.gmra.mxu1 %v1413_v42 }
 0x29d   :  { %v1742_v35 = vmax.f32 %v1659_v8, %v3160_v0  ;;  %v1298_v58 = vadd.f32 %v1297_v30, %v1209_v7 }
 0x29f   :  { %v1778_v54 = vmin.f32 %v1742_v35, %v3165_v36  ;;  %v1369_v1 = vmax.f32 %v1298_v58, 0.0 }
 0x2a0   :  { %v1571_v13 = vpop.f32.mrf.mxu0 }
 0x2a1   :  { %1810 = vst [vmem:[%s3391_s11] sm:$0xff] %v1778_v54  ;;  %v1572_v21 = vadd.f32 %v3152_v56, %v1571_v13  ;;  %v1660_v50 = vpop.f32.mrf.mxu1 }
 0x2a2   :  { %v1210_v61 = vpop.f32.mrf.mxu2 }
 0x2a3   :  { %v1661_v11 = vadd.f32 %v1660_v50, %v1572_v21  ;;  %v1211_v45 = vadd.f32 %v1210_v61, %v3072_v60  ;;  %v1299_v25 = vpop.f32.mrf.mxu3 }
 0x2a5   :  { %v1743_v41 = vmax.f32 %v1661_v11, %v3160_v0  ;;  %v1300_v44 = vadd.f32 %v1299_v25, %v1211_v45 }
 0x2a7   :  { %v1779_v23 = vmin.f32 %v1743_v41, %v3165_v36  ;;  %v1371_v17 = vmax.f32 %v1300_v44, 0.0 }
 0x2a8   :  { %v1574_v43 = vpop.f32.mrf.mxu0 }
 0x2a9   :  { %1811 = vst [vmem:[%s3391_s11 + $0x8] sm:$0xff] %v1779_v23  ;;  %v1415_v2 = vpack.c.bf16 %v1371_v17, %v1369_v1  ;;  %v1575_v22 = vadd.f32 %v3152_v56, %v1574_v43  ;;  %v1663_v19 = vpop.f32.mrf.mxu1 }
 0x2aa   :  { %v1213_v24 = vpop.f32.mrf.mxu2 }
 0x2ab   :  { %v1664_v62 = vadd.f32 %v1663_v19, %v1575_v22  ;;  %v1302_v47 = vpop.f32.mrf.mxu3  ;;  %1613 = vmatmul.bf16.gmra.mxu0 %v3098_v9  ;;  %v1214_v29 = vadd.f32 %v1213_v24, %v3072_v60 }
 0x2ac   :  { %1702 = vmatmul.bf16.gmra.mxu1 %v1415_v2 }
 0x2ad   :  { %v1744_v31 = vmax.f32 %v1664_v62, %v3160_v0  ;;  %v1303_v52 = vadd.f32 %v1302_v47, %v1214_v29 }
 0x2af   :  { %v1780_v39 = vmin.f32 %v1744_v31, %v3165_v36  ;;  %v1373_v38 = vmax.f32 %v1303_v52, 0.0 }
 0x2b0   :  { %v1576_v57 = vpop.f32.mrf.mxu0 }
 0x2b1   :  { %1812 = vst [vmem:[%s3391_s11 + $0x10] sm:$0xff] %v1780_v39  ;;  %v1577_v6 = vadd.f32 %v3152_v56, %v1576_v57  ;;  %v1665_v15 = vpop.f32.mrf.mxu1 }
 0x2b2   :  { %v1215_v37 = vpop.f32.mrf.mxu2 }
 0x2b3   :  { %v1666_v16 = vadd.f32 %v1665_v15, %v1577_v6  ;;  %v1216_v9 = vadd.f32 %v1215_v37, %v3072_v60  ;;  %v1304_v53 = vpop.f32.mrf.mxu3 }
 0x2b5   :  { %v1745_v51 = vmax.f32 %v1666_v16, %v3160_v0  ;;  %v1305_v34 = vadd.f32 %v1304_v53, %v1216_v9 }
 0x2b7   :  { %v1781_v49 = vmin.f32 %v1745_v51, %v3165_v36  ;;  %v1375_v59 = vmax.f32 %v1305_v34, 0.0 }
 0x2b8   :  { %v1579_v32 = vpop.f32.mrf.mxu0 }
 0x2b9   :  { %1813 = vst [vmem:[%s3391_s11 + $0x18] sm:$0xff] %v1781_v49  ;;  %v1417_v10 = vpack.c.bf16 %v1375_v59, %v1373_v38  ;;  %v1580_v46 = vadd.f32 %v3152_v56, %v1579_v32  ;;  %v1668_v48 = vpop.f32.mrf.mxu1 }
 0x2ba   :  { %v1218_v20 = vpop.f32.mrf.mxu2 }
 0x2bb   :  { %v1669_v33 = vadd.f32 %v1668_v48, %v1580_v46  ;;  %v1307_v26 = vpop.f32.mrf.mxu3  ;;  %1618 = vmatmul.bf16.gmra.mxu0 %v3107_v28  ;;  %v1219_v42 = vadd.f32 %v1218_v20, %v3072_v60 }
 0x2bc   :  { %1707 = vmatmul.bf16.gmra.mxu1 %v1417_v10 }
 0x2bd   :  { %v1746_v27 = vmax.f32 %v1669_v33, %v3160_v0  ;;  %v1308_v30 = vadd.f32 %v1307_v26, %v1219_v42 }
 0x2bf   :  { %v1782_v63 = vmin.f32 %v1746_v27, %v3165_v36  ;;  %v1377_v21 = vmax.f32 %v1308_v30, 0.0 }
 0x2c0   :  { %v1581_v4 = vpop.f32.mrf.mxu0 }
 0x2c1   :  { %1814 = vst [vmem:[%s3391_s11 + $0x20] sm:$0xff] %v1782_v63  ;;  %v1582_v3 = vadd.f32 %v3152_v56, %v1581_v4  ;;  %v1670_v5 = vpop.f32.mrf.mxu1 }
 0x2c2   :  { %v1220_v8 = vpop.f32.mrf.mxu2 }
 0x2c3   :  { %v1671_v35 = vadd.f32 %v1670_v5, %v1582_v3  ;;  %v1221_v28 = vadd.f32 %v1220_v8, %v3072_v60  ;;  %v1309_v54 = vpop.f32.mrf.mxu3 }
 0x2c5   :  { %v1747_v7 = vmax.f32 %v1671_v35, %v3160_v0  ;;  %v1310_v13 = vadd.f32 %v1309_v54, %v1221_v28 }
 0x2c7   :  { %v1783_v50 = vmin.f32 %v1747_v7, %v3165_v36  ;;  %v1379_v61 = vmax.f32 %v1310_v13, 0.0 }
 0x2c8   :  { %v1584_v58 = vpop.f32.mrf.mxu0 }
 0x2c9   :  { %1815 = vst [vmem:[%s3391_s11 + $0x28] sm:$0xff] %v1783_v50  ;;  %v1419_v11 = vpack.c.bf16 %v1379_v61, %v1377_v21  ;;  %v1585_v45 = vadd.f32 %v3152_v56, %v1584_v58  ;;  %v1673_v25 = vpop.f32.mrf.mxu1 }
 0x2ca   :  { %v1223_v41 = vpop.f32.mrf.mxu2 }
 0x2cb   :  { %v1674_v44 = vadd.f32 %v1673_v25, %v1585_v45  ;;  %v1312_v1 = vpop.f32.mrf.mxu3  ;;  %1623 = vmatmul.bf16.gmra.mxu0 %v3116_v14  ;;  %v1224_v43 = vadd.f32 %v1223_v41, %v3072_v60 }
 0x2cc   :  { %1712 = vmatmul.bf16.gmra.mxu1 %v1419_v11 }
 0x2cd   :  { %v1748_v23 = vmax.f32 %v1674_v44, %v3160_v0  ;;  %v1313_v62 = vadd.f32 %v1312_v1, %v1224_v43 }
 0x2cf   :  { %v1784_v17 = vmin.f32 %v1748_v23, %v3165_v36  ;;  %v1381_v57 = vmax.f32 %v1313_v62, 0.0 }
 0x2d0   :  { %v1586_v2 = vpop.f32.mrf.mxu0 }
 0x2d1   :  { %1816 = vst [vmem:[%s3391_s11 + $0x30] sm:$0xff] %v1784_v17  ;;  %v1587_v22 = vadd.f32 %v3152_v56, %v1586_v2  ;;  %v1675_v19 = vpop.f32.mrf.mxu1 }
 0x2d2   :  { %v1225_v24 = vpop.f32.mrf.mxu2 }
 0x2d3   :  { %v1676_v47 = vadd.f32 %v1675_v19, %v1587_v22  ;;  %v1226_v14 = vadd.f32 %v1225_v24, %v3072_v60  ;;  %v1314_v31 = vpop.f32.mrf.mxu3 }
 0x2d5   :  { %v1749_v39 = vmax.f32 %v1676_v47, %v3160_v0  ;;  %v1315_v29 = vadd.f32 %v1314_v31, %v1226_v14 }
 0x2d7   :  { %v1785_v6 = vmin.f32 %v1749_v39, %v3165_v36  ;;  %v1383_v15 = vmax.f32 %v1315_v29, 0.0 }
 0x2d8   :  { %v1589_v37 = vpop.f32.mrf.mxu0 }
 0x2d9   :  { %1817 = vst [vmem:[%s3391_s11 + $0x38] sm:$0xff] %v1785_v6  ;;  %v1421_v52 = vpack.c.bf16 %v1383_v15, %v1381_v57  ;;  %v1590_v16 = vadd.f32 %v3152_v56, %v1589_v37  ;;  %v1678_v9 = vpop.f32.mrf.mxu1 }
 0x2da   :  { %v1228_v53 = vpop.f32.mrf.mxu2 }
 0x2db   :  { %v1679_v51 = vadd.f32 %v1678_v9, %v1590_v16  ;;  %v1317_v34 = vpop.f32.mrf.mxu3  ;;  %1628 = vmatmul.bf16.gmra.mxu0 %v3125_v55  ;;  %v1229_v59 = vadd.f32 %v1228_v53, %v3072_v60 }
 0x2dc   :  { %1717 = vmatmul.bf16.gmra.mxu1 %v1421_v52 }
 0x2dd   :  { %v1750_v38 = vmax.f32 %v1679_v51, %v3160_v0  ;;  %v1318_v20 = vadd.f32 %v1317_v34, %v1229_v59 }
 0x2df   :  { %v1786_v49 = vmin.f32 %v1750_v38, %v3165_v36  ;;  %v1385_v42 = vmax.f32 %v1318_v20, 0.0 }
 0x2e0   :  { %v1591_v32 = vpop.f32.mrf.mxu0 }
 0x2e1   :  { %1818 = vst [vmem:[%s3391_s11 + $0x40] sm:$0xff] %v1786_v49  ;;  %v1592_v10 = vadd.f32 %v3152_v56, %v1591_v32  ;;  %v1680_v46 = vpop.f32.mrf.mxu1 }
 0x2e2   :  { %v1230_v48 = vpop.f32.mrf.mxu2 }
 0x2e3   :  { %v1681_v33 = vadd.f32 %v1680_v46, %v1592_v10  ;;  %v1231_v55 = vadd.f32 %v1230_v48, %v3072_v60  ;;  %v1319_v26 = vpop.f32.mrf.mxu3 }
 0x2e5   :  { %v1751_v27 = vmax.f32 %v1681_v33, %v3160_v0  ;;  %v1320_v63 = vadd.f32 %v1319_v26, %v1231_v55 }
 0x2e7   :  { %v1787_v4 = vmin.f32 %v1751_v27, %v3165_v36  ;;  %v1387_v3 = vmax.f32 %v1320_v63, 0.0 }
 0x2e8   :  { %v1594_v5 = vpop.f32.mrf.mxu0 }
 0x2e9   :  { %1819 = vst [vmem:[%s3391_s11 + $0x48] sm:$0xff] %v1787_v4  ;;  %v1423_v8 = vpack.c.bf16 %v1387_v3, %v1385_v42  ;;  %v1595_v30 = vadd.f32 %v3152_v56, %v1594_v5  ;;  %v1683_v35 = vpop.f32.mrf.mxu1 }
 0x2ea   :  { %v1233_v28 = vpop.f32.mrf.mxu2 }
 0x2eb   :  { %v1684_v54 = vadd.f32 %v1683_v35, %v1595_v30  ;;  %v1322_v7 = vpop.f32.mrf.mxu3  ;;  %1633 = vmatmul.bf16.gmra.mxu0 %v3134_v40  ;;  %v1234_v50 = vadd.f32 %v1233_v28, %v3072_v60 }
 0x2ec   :  { %1722 = vmatmul.bf16.gmra.mxu1 %v1423_v8 }
 0x2ed   :  { %v1752_v13 = vmax.f32 %v1684_v54, %v3160_v0  ;;  %v1323_v25 = vadd.f32 %v1322_v7, %v1234_v50 }
 0x2ef   :  { %v1788_v21 = vmin.f32 %v1752_v13, %v3165_v36  ;;  %v1389_v17 = vmax.f32 %v1323_v25, 0.0 }
 0x2f0   :  { %v1596_v61 = vpop.f32.mrf.mxu0 }
 0x2f1   :  { %1820 = vst [vmem:[%s3391_s11 + $0x50] sm:$0xff] %v1788_v21  ;;  %v1597_v58 = vadd.f32 %v3152_v56, %v1596_v61  ;;  %v1685_v11 = vpop.f32.mrf.mxu1 }
 0x2f2   :  { %v1235_v45 = vpop.f32.mrf.mxu2 }
 0x2f3   :  { %v1686_v41 = vadd.f32 %v1685_v11, %v1597_v58  ;;  %v1236_v40 = vadd.f32 %v1235_v45, %v3072_v60  ;;  %v1324_v44 = vpop.f32.mrf.mxu3 }
 0x2f5   :  { %v1753_v1 = vmax.f32 %v1686_v41, %v3160_v0  ;;  %v1325_v23 = vadd.f32 %v1324_v44, %v1236_v40 }
 0x2f7   :  { %v1789_v43 = vmin.f32 %v1753_v1, %v3165_v36  ;;  %v1391_v2 = vmax.f32 %v1325_v23, 0.0 }
 0x2f8   :  { %v1599_v22 = vpop.f32.mrf.mxu0 }
 0x2f9   :  { %1821 = vst [vmem:[%s3391_s11 + $0x58] sm:$0xff] %v1789_v43  ;;  %v1425_v19 = vpack.c.bf16 %v1391_v2, %v1389_v17  ;;  %v1600_v24 = vadd.f32 %v3152_v56, %v1599_v22  ;;  %v1688_v62 = vpop.f32.mrf.mxu1 }
 0x2fa   :  { %v1238_v47 = vpop.f32.mrf.mxu2 }
 0x2fb   :  { %v1689_v14 = vadd.f32 %v1688_v62, %v1600_v24  ;;  %v1327_v31 = vpop.f32.mrf.mxu3  ;;  %1638 = vmatmul.bf16.gmra.mxu0 %v3142_v12  ;;  %v1239_v57 = vadd.f32 %v1238_v47, %v3072_v60 }
 0x2fc   :  { %1727 = vmatmul.bf16.gmra.mxu1 %v1425_v19 }
 0x2fd   :  { %v1754_v39 = vmax.f32 %v1689_v14, %v3160_v0  ;;  %v1328_v16 = vadd.f32 %v1327_v31, %v1239_v57 }
 0x2ff   :  { %v1790_v29 = vmin.f32 %v1754_v39, %v3165_v36  ;;  %v1393_v38 = vmax.f32 %v1328_v16, 0.0 }
 0x300   :  { %v1601_v6 = vpop.f32.mrf.mxu0 }
 0x301   :  { %1822 = vst [vmem:[%s3391_s11 + $0x60] sm:$0xff] %v1790_v29  ;;  %v1602_v15 = vadd.f32 %v3152_v56, %v1601_v6  ;;  %v1690_v37 = vpop.f32.mrf.mxu1 }
 0x302   :  { %v1240_v52 = vpop.f32.mrf.mxu2 }
 0x303   :  { %v1691_v9 = vadd.f32 %v1690_v37, %v1602_v15  ;;  %v1241_v12 = vadd.f32 %v1240_v52, %v3072_v60  ;;  %v1329_v53 = vpop.f32.mrf.mxu3 }
 0x305   :  { %v1755_v51 = vmax.f32 %v1691_v9, %v3160_v0  ;;  %v1330_v34 = vadd.f32 %v1329_v53, %v1241_v12 }
 0x307   :  { %v1791_v49 = vmin.f32 %v1755_v51, %v3165_v36  ;;  %v1395_v59 = vmax.f32 %v1330_v34, 0.0 }
 0x308   :  { %v1604_v32 = vpop.f32.mrf.mxu0 }
 0x309   :  { %1823 = vst [vmem:[%s3391_s11 + $0x68] sm:$0xff] %v1791_v49  ;;  %v1427_v10 = vpack.c.bf16 %v1395_v59, %v1393_v38  ;;  %v1605_v46 = vadd.f32 %v3152_v56, %v1604_v32  ;;  %v1693_v48 = vpop.f32.mrf.mxu1 }
 0x30b   :  { %v1694_v20 = vadd.f32 %v1693_v48, %v1605_v46  ;;  %1643 = vmatmul.bf16.gmra.mxu0 %v3154_v18 }
 0x30c   :  { %1732 = vmatmul.bf16.gmra.mxu1 %v1427_v10 }
 0x30d   :  { %v1756_v60 = vmax.f32 %v1694_v20, %v3160_v0 }
 0x30f   :  { %v1792_v33 = vmin.f32 %v1756_v60, %v3165_v36 }
 0x310   :  { %v1606_v55 = vpop.f32.mrf.mxu0 }
 0x311   :  { %1824 = vst [vmem:[%s3391_s11 + $0x70] sm:$0xff] %v1792_v33  ;;  %v1607_v26 = vadd.f32 %v3152_v56, %v1606_v55  ;;  %v1695_v27 = vpop.f32.mrf.mxu1 }
 0x313   :  { %v1696_v63 = vadd.f32 %v1695_v27, %v1607_v26 }
 0x315   :  { %v1757_v42 = vmax.f32 %v1696_v63, %v3160_v0 }
 0x317   :  { %v1793_v4 = vmin.f32 %v1757_v42, %v3165_v36 }
 0x318   :  { %v1609_v3 = vpop.f32.mrf.mxu0 }
 0x319   :  { %1825 = vst [vmem:[%s3391_s11 + $0x78] sm:$0xff] %v1793_v4  ;;  %v1610_v18 = vadd.f32 %v3152_v56, %v1609_v3  ;;  %v1698_v5 = vpop.f32.mrf.mxu1 }
 0x31b   :  { %v1699_v8 = vadd.f32 %v1698_v5, %v1610_v18 }
 0x31d   :  { %v1758_v30 = vmax.f32 %v1699_v8, %v3160_v0 }
 0x31f   :  { %v1794_v35 = vmin.f32 %v1758_v30, %v3165_v36 }
 0x320   :  { %v1611_v28 = vpop.f32.mrf.mxu0 }
 0x321   :  { %1826 = vst [vmem:[%s3391_s11 + $0x80] sm:$0xff] %v1794_v35  ;;  %v1612_v54 = vadd.f32 %v3152_v56, %v1611_v28  ;;  %v1700_v7 = vpop.f32.mrf.mxu1 }
 0x323   :  { %v1701_v13 = vadd.f32 %v1700_v7, %v1612_v54 }
 0x325   :  { %v1759_v21 = vmax.f32 %v1701_v13, %v3160_v0 }
 0x327   :  { %v1795_v50 = vmin.f32 %v1759_v21, %v3165_v36 }
 0x328   :  { %v1614_v61 = vpop.f32.mrf.mxu0 }
 0x329   :  { %1827 = vst [vmem:[%s3391_s11 + $0x88] sm:$0xff] %v1795_v50  ;;  %v1615_v58 = vadd.f32 %v3152_v56, %v1614_v61  ;;  %v1703_v11 = vpop.f32.mrf.mxu1 }
 0x32b   :  { %v1704_v45 = vadd.f32 %v1703_v11, %v1615_v58 }
 0x32d   :  { %v1760_v25 = vmax.f32 %v1704_v45, %v3160_v0 }
 0x32f   :  { %v1796_v41 = vmin.f32 %v1760_v25, %v3165_v36 }
 0x330   :  { %v1616_v40 = vpop.f32.mrf.mxu0 }
 0x331   :  { %1828 = vst [vmem:[%s3391_s11 + $0x90] sm:$0xff] %v1796_v41  ;;  %v1617_v44 = vadd.f32 %v3152_v56, %v1616_v40  ;;  %v1705_v1 = vpop.f32.mrf.mxu1 }
 0x333   :  { %v1706_v23 = vadd.f32 %v1705_v1, %v1617_v44 }
 0x335   :  { %v1761_v17 = vmax.f32 %v1706_v23, %v3160_v0 }
 0x337   :  { %v1797_v43 = vmin.f32 %v1761_v17, %v3165_v36 }
 0x338   :  { %v1619_v2 = vpop.f32.mrf.mxu0 }
 0x339   :  { %1829 = vst [vmem:[%s3391_s11 + $0x98] sm:$0xff] %v1797_v43  ;;  %v1620_v22 = vadd.f32 %v3152_v56, %v1619_v2  ;;  %v1708_v19 = vpop.f32.mrf.mxu1 }
 0x33b   :  { %v1709_v24 = vadd.f32 %v1708_v19, %v1620_v22 }
 0x33d   :  { %v1762_v62 = vmax.f32 %v1709_v24, %v3160_v0 }
 0x33f   :  { %v1798_v47 = vmin.f32 %v1762_v62, %v3165_v36 }
 0x340   :  { %v1621_v14 = vpop.f32.mrf.mxu0 }
 0x341   :  { %1830 = vst [vmem:[%s3391_s11 + $0xa0] sm:$0xff] %v1798_v47  ;;  %v1622_v31 = vadd.f32 %v3152_v56, %v1621_v14  ;;  %v1710_v39 = vpop.f32.mrf.mxu1 }
 0x343   :  { %v1711_v29 = vadd.f32 %v1710_v39, %v1622_v31 }
 0x345   :  { %v1763_v57 = vmax.f32 %v1711_v29, %v3160_v0 }
 0x347   :  { %v1799_v6 = vmin.f32 %v1763_v57, %v3165_v36 }
 0x348   :  { %v1624_v15 = vpop.f32.mrf.mxu0 }
 0x349   :  { %1831 = vst [vmem:[%s3391_s11 + $0xa8] sm:$0xff] %v1799_v6  ;;  %v1625_v37 = vadd.f32 %v3152_v56, %v1624_v15  ;;  %v1713_v52 = vpop.f32.mrf.mxu1 }
 0x34b   :  { %v1714_v16 = vadd.f32 %v1713_v52, %v1625_v37 }
 0x34d   :  { %v1764_v9 = vmax.f32 %v1714_v16, %v3160_v0 }
 0x34f   :  { %v1800_v12 = vmin.f32 %v1764_v9, %v3165_v36 }
 0x350   :  { %v1626_v53 = vpop.f32.mrf.mxu0 }
 0x351   :  { %1832 = vst [vmem:[%s3391_s11 + $0xb0] sm:$0xff] %v1800_v12  ;;  %v1627_v51 = vadd.f32 %v3152_v56, %v1626_v53  ;;  %v1715_v34 = vpop.f32.mrf.mxu1 }
 0x353   :  { %v1716_v38 = vadd.f32 %v1715_v34, %v1627_v51 }
 0x355   :  { %v1765_v49 = vmax.f32 %v1716_v38, %v3160_v0 }
 0x357   :  { %v1801_v59 = vmin.f32 %v1765_v49, %v3165_v36 }
 0x358   :  { %v1629_v32 = vpop.f32.mrf.mxu0 }
 0x359   :  { %1833 = vst [vmem:[%s3391_s11 + $0xb8] sm:$0xff] %v1801_v59  ;;  %v1630_v10 = vadd.f32 %v3152_v56, %v1629_v32  ;;  %v1718_v46 = vpop.f32.mrf.mxu1 }
 0x35b   :  { %v1719_v48 = vadd.f32 %v1718_v46, %v1630_v10 }
 0x35d   :  { %v1766_v20 = vmax.f32 %v1719_v48, %v3160_v0 }
 0x35f   :  { %v1802_v60 = vmin.f32 %v1766_v20, %v3165_v36 }
 0x360   :  { %v1631_v33 = vpop.f32.mrf.mxu0 }
 0x361   :  { %1834 = vst [vmem:[%s3391_s11 + $0xc0] sm:$0xff] %v1802_v60  ;;  %v1632_v55 = vadd.f32 %v3152_v56, %v1631_v33  ;;  %v1720_v26 = vpop.f32.mrf.mxu1 }
 0x363   :  { %v1721_v27 = vadd.f32 %v1720_v26, %v1632_v55 }
 0x365   :  { %v1767_v63 = vmax.f32 %v1721_v27, %v3160_v0 }
 0x367   :  { %v1803_v42 = vmin.f32 %v1767_v63, %v3165_v36 }
 0x368   :  { %v1634_v4 = vpop.f32.mrf.mxu0 }
 0x369   :  { %1835 = vst [vmem:[%s3391_s11 + $0xc8] sm:$0xff] %v1803_v42  ;;  %v1635_v3 = vadd.f32 %v3152_v56, %v1634_v4  ;;  %v1723_v18 = vpop.f32.mrf.mxu1 }
 0x36b   :  { %v1724_v5 = vadd.f32 %v1723_v18, %v1635_v3 }
 0x36d   :  { %v1768_v8 = vmax.f32 %v1724_v5, %v3160_v0 }
 0x36f   :  { %v1804_v30 = vmin.f32 %v1768_v8, %v3165_v36 }
 0x370   :  { %v1636_v35 = vpop.f32.mrf.mxu0 }
 0x371   :  { %1836 = vst [vmem:[%s3391_s11 + $0xd0] sm:$0xff] %v1804_v30  ;;  %v1637_v28 = vadd.f32 %v3152_v56, %v1636_v35  ;;  %v1725_v54 = vpop.f32.mrf.mxu1 }
 0x373   :  { %v1726_v7 = vadd.f32 %v1725_v54, %v1637_v28 }
 0x375   :  { %v1769_v13 = vmax.f32 %v1726_v7, %v3160_v0 }
 0x377   :  { %v1805_v21 = vmin.f32 %v1769_v13, %v3165_v36 }
 0x378   :  { %v1639_v50 = vpop.f32.mrf.mxu0 }
 0x379   :  { %1837 = vst [vmem:[%s3391_s11 + $0xd8] sm:$0xff] %v1805_v21  ;;  %v1640_v61 = vadd.f32 %v3152_v56, %v1639_v50  ;;  %v1728_v58 = vpop.f32.mrf.mxu1 }
 0x37b   :  { %v1729_v11 = vadd.f32 %v1728_v58, %v1640_v61 }
 0x37d   :  { %v1770_v45 = vmax.f32 %v1729_v11, %v3160_v0 }
 0x37f   :  { %v1806_v25 = vmin.f32 %v1770_v45, %v3165_v36 }
 0x380   :  { %v1641_v41 = vpop.f32.mrf.mxu0 }
 0x381   :  { %1838 = vst [vmem:[%s3391_s11 + $0xe0] sm:$0xff] %v1806_v25  ;;  %v1642_v40 = vadd.f32 %v3152_v56, %v1641_v41  ;;  %v1730_v44 = vpop.f32.mrf.mxu1 }
 0x383   :  { %v1731_v1 = vadd.f32 %v1730_v44, %v1642_v40 }
 0x385   :  { %v1771_v23 = vmax.f32 %v1731_v1, %v3160_v0 }
 0x387   :  { %v1807_v17 = vmin.f32 %v1771_v23, %v3165_v36 }
 0x388   :  { %v1644_v43 = vpop.f32.mrf.mxu0 }
 0x389   :  { %1839 = vst [vmem:[%s3391_s11 + $0xe8] sm:$0xff] %v1807_v17  ;;  %v1645_v2 = vadd.f32 %v3152_v56, %v1644_v43  ;;  %v1733_v22 = vpop.f32.mrf.mxu1 }
 0x38b   :  { %v1734_v19 = vadd.f32 %v1733_v22, %v1645_v2 }
 0x38d   :  { %v1772_v24 = vmax.f32 %v1734_v19, %v3160_v0 }
 0x38f   :  { %v1808_v62 = vmin.f32 %v1772_v24, %v3165_v36 }
 0x390   :  { %v1646_v47 = vpop.f32.mrf.mxu0 }
 0x391   :  { %1840 = vst [vmem:[%s3391_s11 + $0xf0] sm:$0xff] %v1808_v62  ;;  %v1647_v14 = vadd.f32 %v3152_v56, %v1646_v47  ;;  %v1735_v31 = vpop.f32.mrf.mxu1 }
 0x393   :  { %v1736_v39 = vadd.f32 %v1735_v31, %v1647_v14 }
 0x395   :  { %v1773_v29 = vmax.f32 %v1736_v39, %v3160_v0 }
 0x397   :  { %v1809_v57 = vmin.f32 %v1773_v29, %v3165_v36 }
 0x399   :  { %1841 = vst [vmem:[%s3391_s11 + $0xf8] sm:$0xff] %v1809_v57 }

</bundles_post_ra>
